<compile_context>
chip_gen: v6e
topology: v6e:2x2x1
jax: 0.10.0
libtpu: 0.0.40
codegen_flags: <defaults>
</compile_context>

<pallas_src>
import functools

import jax
import jax.numpy as jnp
from jax.experimental import pallas as pl
from jax.experimental.pallas import tpu as pltpu


def _residual_conv3x3_kernel(x_ref, w_ref, b_ref, o_ref):
    """Fused y = x + conv3x3_same(x) + bias for one NHWC batch block."""
    x = x_ref[...]                                   # (bb, H, W, C) bf16
    bb, h, w, c = x.shape
    m = bb * h * w
    x_flat = x.reshape(m, c)                         # merge of major dims: free

    # One wide MXU matmul covering all 9 taps: (M, C) @ (C, 9C) -> (M, 9C) f32.
    p = jnp.dot(x_flat, w_ref[...], preferred_element_type=jnp.float32)

    # Per-row spatial indices for the SAME-padding border masks.
    hh = jax.lax.broadcasted_iota(jnp.int32, (bb, h, w, c), 1).reshape(m, c)
    ww = jax.lax.broadcasted_iota(jnp.int32, (bb, h, w, c), 2).reshape(m, c)
    top_ok = hh >= 1            # row h-1 exists
    bot_ok = hh <= h - 2        # row h+1 exists
    left_ok = ww >= 1           # col w-1 exists
    right_ok = ww <= w - 2      # col w+1 exists
    row_mask = {-1: top_ok, 0: None, 1: bot_ok}
    col_mask = {-1: left_ok, 0: None, 1: right_ok}

    # Centre tap (ky=1, kx=1): no shift, no mask; bias fused into the init.
    acc = p[:, 4 * c:5 * c] + b_ref[...]             # (M, C) f32

    # Remaining 8 taps: move each tap's contribution to its output row with a
    # sublane roll (XLU slot) and zero the out-of-bounds rows/cols (VPU select).
    for ky in range(3):
        for kx in range(3):
            if ky == 1 and kx == 1:
                continue
            oy, ox = ky - 1, kx - 1
            t = ky * 3 + kx
            pt = p[:, t * c:(t + 1) * c]             # lane-aligned static slice
            shift = (-(oy * w + ox)) % m             # static Python int
            pt = pltpu.roll(pt, shift=shift, axis=0)
            rm, cm = row_mask[oy], col_mask[ox]
            if rm is None:
                mask = cm
            elif cm is None:
                mask = rm
            else:
                mask = jnp.logical_and(rm, cm)
            acc = acc + jnp.where(mask, pt, 0.0)

    # Residual add in f32; single downcast on store.
    y = acc + x_flat.astype(jnp.float32)
    o_ref[...] = y.reshape(bb, h, w, c).astype(o_ref.dtype)


def prepare_conv_params(w_oihw, bias):
    """One-time weight prep: PyTorch OIHW -> (Cin, 9*Cout) bf16 matrix.

    Column block t = ky*3 + kx holds w[ky, kx] as a (Cin, Cout) matrix so the
    kernel's single matmul produces all 9 per-tap partial results at once.
    """
    cout, cin, kh, kw = w_oihw.shape
    assert (kh, kw) == (3, 3)
    w_ihwo = jnp.transpose(w_oihw, (1, 2, 3, 0))      # (Cin, 3, 3, Cout)
    w_mat = w_ihwo.reshape(cin, kh * kw * cout).astype(jnp.bfloat16)
    b_mat = bias.reshape(1, cout).astype(jnp.float32)
    return w_mat, b_mat


@functools.partial(jax.jit, static_argnames=("batch_block",))
def residual_conv3x3(x_nhwc, w_mat, b_mat, *, batch_block=1):
    """y = x + (conv3x3_same(x) + bias), NHWC, bf16 I/O, one fused kernel."""
    b, h, w, c = x_nhwc.shape
    cin, k9c = w_mat.shape
    assert cin == c and k9c == 9 * c
    bb = min(batch_block, b)
    assert b % bb == 0, "batch must be divisible by the batch block"

    x_bf16 = x_nhwc.astype(jnp.bfloat16)              # no-op if already bf16

    return pl.pallas_call(
        _residual_conv3x3_kernel,
        out_shape=jax.ShapeDtypeStruct((b, h, w, c), jnp.bfloat16),
        grid_spec=pltpu.PrefetchScalarGridSpec(
            num_scalar_prefetch=0,
            grid=(b // bb,),
            in_specs=[
                # activations: one batch block per grid step
                pl.BlockSpec((bb, h, w, c), lambda n: (n, 0, 0, 0)),
                # weights / bias: constant block index -> VMEM-resident
                pl.BlockSpec((c, 9 * c), lambda n: (0, 0)),
                pl.BlockSpec((1, c), lambda n: (0, 0)),
            ],
            out_specs=pl.BlockSpec((bb, h, w, c), lambda n: (n, 0, 0, 0)),
        ),
        compiler_params=pltpu.CompilerParams(
            dimension_semantics=("parallel",),        # megacore sharding on v7x
        ),
    )(x_bf16, w_mat, b_mat)


if __name__ == "__main__":
    key = jax.random.PRNGKey(0)
    kx, kw, kb = jax.random.split(key, 3)

    # Shapes of the first Residual block in the CIFAR model (128ch @ 16x16).
    B, C, H, W = 4, 128, 16, 16
    x = jax.random.normal(kx, (B, H, W, C), jnp.float32).astype(jnp.bfloat16)
    w_oihw = jax.random.normal(kw, (C, C, 3, 3), jnp.float32) * 0.05
    bias = jax.random.normal(kb, (C,), jnp.float32) * 0.1

    w_mat, b_mat = prepare_conv_params(w_oihw, bias)
    out = residual_conv3x3(x, w_mat, b_mat, batch_block=1)
    out = jax.block_until_ready(out)

    # Reference with matching bf16 operand rounding and bf16 output.
    x32 = x.astype(jnp.float32)
    w_hwio = jnp.transpose(w_oihw, (2, 3, 1, 0)).astype(jnp.bfloat16).astype(jnp.float32)
    conv = jax.lax.conv_general_dilated(
        x32, w_hwio, window_strides=(1, 1), padding="SAME",
        dimension_numbers=("NHWC", "HWIO", "NHWC"))
    ref = (x32 + conv + bias.reshape(1, 1, 1, C)).astype(jnp.bfloat16)

    err = float(jnp.max(jnp.abs(out.astype(jnp.float32) - ref.astype(jnp.float32))))
    assert err < 1.5e-1, f"max abs error too large: {err}"
    print("KERNEL_OK")
</pallas_src>

<mosaic_0001>
module attributes {stable_mosaic.version = 11 : i64} {
  func.func @_residual_conv3x3_kernel(%arg0: i32, %arg1: memref<1x16x16x128xbf16, #tpu.memory_space<vmem>>, %arg2: memref<128x1152xbf16, #tpu.memory_space<vmem>>, %arg3: memref<1x128xf32, #tpu.memory_space<vmem>>, %arg4: memref<1x16x16x128xbf16, #tpu.memory_space<vmem>>) attributes {dimension_semantics = [#tpu.dimension_semantics<parallel>], iteration_bounds = array<i64: 4>, scalar_prefetch = 0 : i64, scratch_operands = 0 : i64, tpu.core_type = #tpu.core_type<tc>, window_params = [{transform_indices = @transform_0, window_bounds = array<i64: 1, 16, 16, 128>}, {pipeline_mode = #tpu.pipeline_mode<synchronous>, transform_indices = @transform_1, window_bounds = array<i64: 128, 1152>}, {pipeline_mode = #tpu.pipeline_mode<synchronous>, transform_indices = @transform_2, window_bounds = array<i64: 1, 128>}, {transform_indices = @transform_3, window_bounds = array<i64: 1, 16, 16, 128>}]} {
    %c0 = arith.constant 0 : index
    %c0_0 = arith.constant 0 : index
    %c0_1 = arith.constant 0 : index
    %c0_2 = arith.constant 0 : index
    %0 = vector.load %arg1[%c0, %c0_0, %c0_1, %c0_2] : memref<1x16x16x128xbf16, #tpu.memory_space<vmem>>, vector<1x16x16x128xbf16>
    %1 = vector.shape_cast %0 : vector<1x16x16x128xbf16> to vector<256x128xbf16>
    %c0_3 = arith.constant 0 : index
    %c0_4 = arith.constant 0 : index
    %2 = vector.load %arg2[%c0_3, %c0_4] : memref<128x1152xbf16, #tpu.memory_space<vmem>>, vector<128x1152xbf16>
    %cst = arith.constant dense<0.000000e+00> : vector<256x1152xf32>
    %3 = tpu.matmul %1, %2, %cst {dimension_numbers = #tpu.dot_dimension_numbers<[1], [0], [0], [1], [0, 0, 1, 1], [], []>} : vector<256x128xbf16>, vector<128x1152xbf16>, vector<256x1152xf32> -> vector<256x1152xf32>
    %4 = tpu.iota {dimensions = array<i32: 1>} : vector<1x16x16x128xi32>
    %5 = vector.shape_cast %4 : vector<1x16x16x128xi32> to vector<256x128xi32>
    %6 = tpu.iota {dimensions = array<i32: 2>} : vector<1x16x16x128xi32>
    %7 = vector.shape_cast %6 : vector<1x16x16x128xi32> to vector<256x128xi32>
    %c1_i32 = arith.constant 1 : i32
    %8 = vector.broadcast %c1_i32 : i32 to vector<256x128xi32>
    %9 = arith.cmpi sge, %5, %8 : vector<256x128xi32>
    %c14_i32 = arith.constant 14 : i32
    %10 = vector.broadcast %c14_i32 : i32 to vector<256x128xi32>
    %11 = arith.cmpi sle, %5, %10 : vector<256x128xi32>
    %c1_i32_5 = arith.constant 1 : i32
    %12 = vector.broadcast %c1_i32_5 : i32 to vector<256x128xi32>
    %13 = arith.cmpi sge, %7, %12 : vector<256x128xi32>
    %c14_i32_6 = arith.constant 14 : i32
    %14 = vector.broadcast %c14_i32_6 : i32 to vector<256x128xi32>
    %15 = arith.cmpi sle, %7, %14 : vector<256x128xi32>
    %16 = vector.extract_strided_slice %3 {offsets = [0, 512], sizes = [256, 128], strides = [1, 1]} : vector<256x1152xf32> to vector<256x128xf32>
    %c0_7 = arith.constant 0 : index
    %c0_8 = arith.constant 0 : index
    %17 = vector.load %arg3[%c0_7, %c0_8] : memref<1x128xf32, #tpu.memory_space<vmem>>, vector<1x128xf32>
    %18 = vector.broadcast %17 : vector<1x128xf32> to vector<256x128xf32>
    %19 = arith.addf %16, %18 : vector<256x128xf32>
    %20 = vector.extract_strided_slice %3 {offsets = [0, 0], sizes = [256, 128], strides = [1, 1]} : vector<256x1152xf32> to vector<256x128xf32>
    %c17_i32 = arith.constant 17 : i32
    %21 = tpu.dynamic_rotate %20 by %c17_i32 dim 0 : vector<256x128xf32>, i32 -> vector<256x128xf32>
    %22 = arith.andi %9, %13 : vector<256x128xi1>
    %cst_9 = arith.constant 0.000000e+00 : f32
    %23 = vector.broadcast %cst_9 : f32 to vector<256x128xf32>
    %24 = arith.select %22, %21, %23 : vector<256x128xi1>, vector<256x128xf32>
    %25 = arith.addf %19, %24 : vector<256x128xf32>
    %26 = vector.extract_strided_slice %3 {offsets = [0, 128], sizes = [256, 128], strides = [1, 1]} : vector<256x1152xf32> to vector<256x128xf32>
    %c16_i32 = arith.constant 16 : i32
    %27 = tpu.dynamic_rotate %26 by %c16_i32 dim 0 : vector<256x128xf32>, i32 -> vector<256x128xf32>
    %cst_10 = arith.constant 0.000000e+00 : f32
    %28 = vector.broadcast %cst_10 : f32 to vector<256x128xf32>
    %29 = arith.select %9, %27, %28 : vector<256x128xi1>, vector<256x128xf32>
    %30 = arith.addf %25, %29 : vector<256x128xf32>
    %31 = vector.extract_strided_slice %3 {offsets = [0, 256], sizes = [256, 128], strides = [1, 1]} : vector<256x1152xf32> to vector<256x128xf32>
    %c15_i32 = arith.constant 15 : i32
    %32 = tpu.dynamic_rotate %31 by %c15_i32 dim 0 : vector<256x128xf32>, i32 -> vector<256x128xf32>
    %33 = arith.andi %9, %15 : vector<256x128xi1>
    %cst_11 = arith.constant 0.000000e+00 : f32
    %34 = vector.broadcast %cst_11 : f32 to vector<256x128xf32>
    %35 = arith.select %33, %32, %34 : vector<256x128xi1>, vector<256x128xf32>
    %36 = arith.addf %30, %35 : vector<256x128xf32>
    %37 = vector.extract_strided_slice %3 {offsets = [0, 384], sizes = [256, 128], strides = [1, 1]} : vector<256x1152xf32> to vector<256x128xf32>
    %c1_i32_12 = arith.constant 1 : i32
    %38 = tpu.dynamic_rotate %37 by %c1_i32_12 dim 0 : vector<256x128xf32>, i32 -> vector<256x128xf32>
    %cst_13 = arith.constant 0.000000e+00 : f32
    %39 = vector.broadcast %cst_13 : f32 to vector<256x128xf32>
    %40 = arith.select %13, %38, %39 : vector<256x128xi1>, vector<256x128xf32>
    %41 = arith.addf %36, %40 : vector<256x128xf32>
    %42 = vector.extract_strided_slice %3 {offsets = [0, 640], sizes = [256, 128], strides = [1, 1]} : vector<256x1152xf32> to vector<256x128xf32>
    %c255_i32 = arith.constant 255 : i32
    %43 = tpu.dynamic_rotate %42 by %c255_i32 dim 0 : vector<256x128xf32>, i32 -> vector<256x128xf32>
    %cst_14 = arith.constant 0.000000e+00 : f32
    %44 = vector.broadcast %cst_14 : f32 to vector<256x128xf32>
    %45 = arith.select %15, %43, %44 : vector<256x128xi1>, vector<256x128xf32>
    %46 = arith.addf %41, %45 : vector<256x128xf32>
    %47 = vector.extract_strided_slice %3 {offsets = [0, 768], sizes = [256, 128], strides = [1, 1]} : vector<256x1152xf32> to vector<256x128xf32>
    %c241_i32 = arith.constant 241 : i32
    %48 = tpu.dynamic_rotate %47 by %c241_i32 dim 0 : vector<256x128xf32>, i32 -> vector<256x128xf32>
    %49 = arith.andi %11, %13 : vector<256x128xi1>
    %cst_15 = arith.constant 0.000000e+00 : f32
    %50 = vector.broadcast %cst_15 : f32 to vector<256x128xf32>
    %51 = arith.select %49, %48, %50 : vector<256x128xi1>, vector<256x128xf32>
    %52 = arith.addf %46, %51 : vector<256x128xf32>
    %53 = vector.extract_strided_slice %3 {offsets = [0, 896], sizes = [256, 128], strides = [1, 1]} : vector<256x1152xf32> to vector<256x128xf32>
    %c240_i32 = arith.constant 240 : i32
    %54 = tpu.dynamic_rotate %53 by %c240_i32 dim 0 : vector<256x128xf32>, i32 -> vector<256x128xf32>
    %cst_16 = arith.constant 0.000000e+00 : f32
    %55 = vector.broadcast %cst_16 : f32 to vector<256x128xf32>
    %56 = arith.select %11, %54, %55 : vector<256x128xi1>, vector<256x128xf32>
    %57 = arith.addf %52, %56 : vector<256x128xf32>
    %58 = vector.extract_strided_slice %3 {offsets = [0, 1024], sizes = [256, 128], strides = [1, 1]} : vector<256x1152xf32> to vector<256x128xf32>
    %c239_i32 = arith.constant 239 : i32
    %59 = tpu.dynamic_rotate %58 by %c239_i32 dim 0 : vector<256x128xf32>, i32 -> vector<256x128xf32>
    %60 = arith.andi %11, %15 : vector<256x128xi1>
    %cst_17 = arith.constant 0.000000e+00 : f32
    %61 = vector.broadcast %cst_17 : f32 to vector<256x128xf32>
    %62 = arith.select %60, %59, %61 : vector<256x128xi1>, vector<256x128xf32>
    %63 = arith.addf %57, %62 : vector<256x128xf32>
    %64 = arith.extf %1 : vector<256x128xbf16> to vector<256x128xf32>
    %65 = arith.addf %63, %64 : vector<256x128xf32>
    %66 = vector.shape_cast %65 : vector<256x128xf32> to vector<1x16x16x128xf32>
    %67 = arith.truncf %66 : vector<1x16x16x128xf32> to vector<1x16x16x128xbf16>
    %c0_18 = arith.constant 0 : index
    %c0_19 = arith.constant 0 : index
    %c0_20 = arith.constant 0 : index
    %c0_21 = arith.constant 0 : index
    %68 = vector.load %arg4[%c0_18, %c0_19, %c0_20, %c0_21] : memref<1x16x16x128xbf16, #tpu.memory_space<vmem>>, vector<1x16x16x128xbf16>
    tpu.vector_store %arg4[%c0_18, %c0_19, %c0_20, %c0_21], %67 {strides = array<i32>} : memref<1x16x16x128xbf16, #tpu.memory_space<vmem>>, vector<1x16x16x128xbf16>,
    return
  }
  func.func @transform_0(%arg0: i32) -> (i32, i32, i32, i32) {
    %c0_i32 = arith.constant 0 : i32
    %c0_i32_0 = arith.constant 0 : i32
    %c0_i32_1 = arith.constant 0 : i32
    %c0_i32_2 = arith.constant 0 : i32
    return %arg0, %c0_i32, %c0_i32_0, %c0_i32_1 : i32, i32, i32, i32
  }
  func.func @transform_1(%arg0: i32) -> (i32, i32) {
    %c0_i32 = arith.constant 0 : i32
    %c0_i32_0 = arith.constant 0 : i32
    %c0_i32_1 = arith.constant 0 : i32
    return %c0_i32, %c0_i32_0 : i32, i32
  }
  func.func @transform_2(%arg0: i32) -> (i32, i32) {
    %c0_i32 = arith.constant 0 : i32
    %c0_i32_0 = arith.constant 0 : i32
    %c0_i32_1 = arith.constant 0 : i32
    return %c0_i32, %c0_i32_0 : i32, i32
  }
  func.func @transform_3(%arg0: i32) -> (i32, i32, i32, i32) {
    %c0_i32 = arith.constant 0 : i32
    %c0_i32_0 = arith.constant 0 : i32
    %c0_i32_1 = arith.constant 0 : i32
    %c0_i32_2 = arith.constant 0 : i32
    return %arg0, %c0_i32, %c0_i32_0, %c0_i32_1 : i32, i32, i32, i32
  }
}

</mosaic_0001>

<bundles_post_ra>
// kernel: residual_conv3x3.1
= control target key start
LH: loop header
LB: loop body
LE: loop exit
PB: predicated region body
PF: predicated region fallthrough
CT: control target
= control target key end

     0   :  { %8 = vsyncpa [#allocation3], 0  ;;  %s5453_s0 = inlined_call_operand.hbm [shape: bf16[4,16,16,128], index: 0, kind: input, shape index: {}]   ;;  %s5454_s1 = inlined_call_operand.hbm [shape: bf16[128,1152], index: 1, kind: input, shape index: {}]   ;;  %s5455_s2 = inlined_call_operand.vmem [shape: f32[1,128], index: 2, kind: input, shape index: {}]   ;;  %s5456_s3 = inlined_call_operand.hbm [shape: bf16[4,16,16,128], index: 3, kind: output, shape index: {}]  }
   0x1   :  { %10 = vsyncpa [#allocation3 + $0x1], 0 }
   0x2   :  { %11 = vsyncpa [#allocation6], 0 }
   0x3   :  { %12 = vsyncpa [#allocation4], 0 }
   0x4   :  { %14 = vsyncpa [#allocation4 + $0x1], 0  ;;  %s3612_s12 = smov 0   ;;  %s3614_s13 = smov 0  }
   0x5   :  { %s3616_s14 = smov 0   ;;  %s3618_s15 = smov 0  }
   0x6 LB: > { %s3633_s16 = sadd.s32 4294967295, %s3580_s15   ;;  %s2887_s17 = sadd.s32 4294967294, %s3580_s15   ;;  %s3580_s15 = sphi %s3618_s15, %s5719_s15   ;;  %s3576_s14 = sphi %s3616_s14, %s5718_s14   ;;  %s3572_s13 = sphi %s3614_s13, %s5717_s13   ;;  %s3568_s12 = sphi %s3612_s12, %s5716_s12  }
   0x7   : > { %p40_p0 = scmp.ne.s32.totalorder %s3572_s13, %s3568_s12  ;;  %p5457_p1 = scmp.eq.s32.totalorder %s3633_s16, 0 }
   0x8   : > { %p112_p3 = scmp.eq.s32.totalorder %s2887_s17, 3  ;;  %p2888_p5 = scmp.ge.s32.totalorder %s3580_s15, 1 }
   0x9   : > { %p3642_p4 = por %p5457_p1, %p40_p0  ;;  %p119_p7 = scmp.lt.s32.totalorder %s3580_s15, 5 }
   0xa   : > { %p3647_p6 = por %p112_p3, %p40_p0  ;;  %s3582_s21 = smov [#allocation5]  }
   0xb   : > { %s5489_s18 = scalar_select %p3642_p4, 1, 0 }
   0xc   : > { %s5490_s19 = scalar_select %p3647_p6, 1, 0 }
   0xd   : > { %p3652_p8 = pnand %p2888_p5, %p119_p7  ;;  %s131_s22 = sshll.u32 %s3582_s21, 4  ;;  %s132_s22 = int_to_ptr.vmem [resolvable:$true] %s131_s22 }
   0xe   : > { %s3665_s24 = sadd.s32 1, %s3580_s15   ;;  %s27_s25 = sadd.s32 1, %s3576_s14 }
   0xf   : > { %s5491_s20 = scalar_select %p3652_p8, 1, 0 }
  0x10   : > { %p3249_p9 = pneg %p3652_p8  ;;  %s24_s26 = ssub.s32 %s3580_s15, %s3665_s24 }
  0x11   : > { %s3469_s27 = scalar_lea.vmem %s132_s22, 9216  ;;  %p3477_p3 = scmp.lt.s32.totalorder %s132_s22, %s132_s22 }
  0x12   : > { %p3660_p10 = pnand %p3249_p9, %p5457_p1  ;;  %p3470_p12 = scmp.ne.s32.totalorder %s132_s22, %s3469_s27 }
  0x13   : > { %p3478_p5 = scmp.lt.s32.totalorder %s3469_s27, %s3469_s27 }
  0x14   : > { %p3460_p11 = pneg %p3660_p10 }
  0x15   : > { %p3479_p7 = por %p3478_p5, %p3477_p3 }
  0x16   : > { %p3472_p13 = pnand %p3470_p12, %p3460_p11 }
  0x18   : > { %p3473_p0 = pneg %p3472_p13 }
  0x1a   : > { %p3480_p2 = pnand %p3479_p7, %p3473_p0 }
  0x1c   : > { %3483 = shalt.err (!%p3480_p2)
}
  0x1d   : > { %s3583_s28 = smov 576   ;;  %s3584_s29 = smov 36  }
  0x1e   : > { %3252 = dma.hbm_to_vmem [thread:$0]  (!%p3660_p10), %s5454_s1, 9216, %s132_s22, [#allocation6], %s3583_s28, %s3583_s28, %s3584_s29  }
  0x1f   : > { %p25_p9 = scmp.eq.s32.totalorder %s24_s26, 0  ;;  %p34_p11 = scmp.ne.s32.totalorder %s3576_s14, %s3572_s13 }
  0x20   : > { %p35_p12 = scmp.eq.s32.totalorder %s3580_s15, 0  ;;  %p3262_p2 = scmp.lt.s32.totalorder %s3580_s15, 4 }
  0x21   : > { %s3682_s5 = scalar_select %p25_p9, %s3576_s14, %s27_s25  }
  0x22   : > { %p36_p13 = por %p35_p12, %p34_p11  ;;  %p5493_p0 = scmp.eq.s32.totalorder %s3633_s16, 3 }
  0x23   : > { %s148_s7 = sand.u32 1, %s3576_s14   ;;  %s3024_s8 = sshll.u32 %s3580_s15, 11 }
  0x24   : > { %p3686_p3 = por %p5493_p0, %p34_p11  ;;  %s2891_s9 = sshll.u32 %s148_s7, 7 }
  0x25   : > { %s3695_s17 = scalar_lea.hbm %s5453_s0, %s3024_s8  ;;  %s152_s21 = scalar_lea.vmem [#allocation2], %s2891_s9 }
  0x26   : > { %s5494_s6 = scalar_select %p3686_p3, 1, 0 }
  0x27   : > { %s159_s22 = sshll.u32 %s152_s21, 4  ;;  %p3697_p10 = pnand %p3262_p2, %p36_p13  ;;  %s3701_s22 = int_to_ptr.vmem [resolvable:$true] %s159_s22 }
  0x28   : > { %s3703_s25 = scalar_lea.sflag [#allocation3], %s148_s7  ;;  %s3484_s26 = scalar_lea.hbm %s3695_s17, 2048 }
  0x29   : > { %p3485_p5 = scmp.ne.s32.totalorder %s3695_s17, %s3484_s26  ;;  %p3486_p7 = pneg %p3697_p10 }
  0x2a   : > { %s3489_s29 = scalar_lea.hbm %s5453_s0, 8192  ;;  %p3490_p12 = scmp.lt.s32.totalorder %s3695_s17, %s5453_s0 }
  0x2b   : > { %p3487_p9 = pnand %p3486_p7, %p3485_p5  ;;  %p3491_p2 = scmp.lt.s32.totalorder %s3489_s29, %s3484_s26 }
  0x2d   : > { %p3488_p11 = pneg %p3487_p9  ;;  %p3492_p13 = por %p3491_p2, %p3490_p12 }
  0x2f   : > { %p3493_p0 = pnand %p3492_p13, %p3488_p11 }
  0x31   : > { %3496 = shalt.err (!%p3493_p0)
}
  0x32   : > { %s3497_s7 = scalar_lea.vmem %s3701_s22, 2048  ;;  %s3585_s8 = smov [#allocation2]  }
  0x33   : > { %p3498_p1 = scmp.ne.s32.totalorder %s3701_s22, %s3497_s7  ;;  %s3502_s9 = sshll.u32 %s3585_s8, 4  ;;  %s3503_s9 = int_to_ptr.vmem [resolvable:$false] %s3502_s9 }
  0x34   : > { %s3504_s10 = scalar_lea.vmem %s3503_s9, 4096  ;;  %p3505_p9 = scmp.lt.s32.totalorder %s3701_s22, %s3503_s9 }
  0x35   : > { %p3500_p6 = pnand %p3498_p1, %p3486_p7  ;;  %p3506_p3 = scmp.lt.s32.totalorder %s3504_s10, %s3497_s7 }
  0x37   : > { %p3501_p5 = pneg %p3500_p6  ;;  %p3507_p4 = por %p3506_p3, %p3505_p9 }
  0x39   : > { %p3508_p8 = pnand %p3507_p4, %p3501_p5 }
  0x3b   : > { %3511 = shalt.err (!%p3508_p8)
}
  0x3c   : > { %s3586_s11 = smov 64   ;;  %s3587_s21 = smov 4  }
  0x3d   : > { %3256 = dma.hbm_to_vmem [thread:$0]  (!%p3697_p10), %s3695_s17, 2048, %s3701_s22, %s3703_s25, %s3586_s11, %s3586_s11, %s3587_s21  }
  0x3e   : > { %p5496_p1 = scmp.ne.s32.totalorder %s5491_s20, 0 }
  0x40   : > { %171 = sbr.rel (%p5496_p1) target bundleno = 620 (0x26c), region = 32 }
  0x45   : > { %s3727_s26 = sand.u32 1, %s3572_s13   ;;  %p5497_p4 = scmp.ne.s32.totalorder %s5489_s18, 0 }
  0x46   : > { %s2895_s27 = sshll.u32 %s3727_s26, 7  ;;  %s174_s28 = scalar_lea.sflag [#allocation3], %s3727_s26 }
  0x47   : > { %s3733_s29 = scalar_lea.vmem [#allocation2], %s2895_s27 }
  0x48   : > { %3555 = dma.done.wait (%p5497_p4), %s174_s28, 2048  }
  0x49   : > { %3557 = vsyncadd (%p5497_p4), %s174_s28, 4294965248  ;;  %p5498_p6 = scmp.eq.s32.totalorder %s3633_s16, 0 }
  0x4b   : > { %3559 = dma.done.wait (%p5498_p6), [#allocation6], 9216   ;;  %p5499_p8 = pmov %p5498_p6 }
  0x4c   : > { %v5463_v0 = vmov 0   ;;  %v3305_v1 = vld [vmem:[#allocation5 + $0x1fc] ss:$36 sps:$4 sm:$0xff]   ;;  %v3308_v3 = vld [vmem:[#allocation5 + $0x1b4] ss:$36 sps:$4 sm:$0xff]   ;;  %v3754_v26 = vld [vmem:[%s3733_s29 + $0x8] sm:$0xff]  }
  0x4d   : > { %3561 = vsyncadd (%p5499_p8), [#allocation6], 4294958080  ;;  %813 = vmatprep.mubr.bf16.mxu0 %v5463_v0  ;;  %933 = vmatprep.mubr.bf16.mxu1 %v5463_v0  ;;  %v3307_v2 = vld [vmem:[#allocation5 + $0x1f8] ss:$36 sps:$4 sm:$0xff]   ;;  %v3310_v4 = vld [vmem:[#allocation5 + $0x1b0] ss:$36 sps:$4 sm:$0xff]  }
  0x4e   : > { %781 = vmatprep.subr.bf16.mxu0 %v3305_v1  ;;  %3225 = vmatprep.subr.bf16.mxu1 %v3305_v1  ;;  %v3311_v5 = vld [vmem:[#allocation5 + $0x16c] ss:$36 sps:$4 sm:$0xff]   ;;  %v3314_v7 = vld [vmem:[#allocation5 + $0x124] ss:$36 sps:$4 sm:$0xff]   ;;  %v3317_v9 = vld [vmem:[#allocation5 + $0xdc] ss:$36 sps:$4 sm:$0xff]  }
  0x4f   : > { %782 = vmatpush1.bf16.msra.mxu0 %v3307_v2  ;;  %3233 = vmatpush1.bf16.msra.mxu1 %v3307_v2  ;;  %v3313_v6 = vld [vmem:[#allocation5 + $0x168] ss:$36 sps:$4 sm:$0xff]   ;;  %v3316_v8 = vld [vmem:[#allocation5 + $0x120] ss:$36 sps:$4 sm:$0xff]   ;;  %v3319_v10 = vld [vmem:[#allocation5 + $0xd8] ss:$36 sps:$4 sm:$0xff]  }
  0x50   : > { %783 = vmatprep.subr.bf16.mxu0 %v3308_v3  ;;  %3226 = vmatprep.subr.bf16.mxu1 %v3308_v3  ;;  %v3320_v11 = vld [vmem:[#allocation5 + $0x94] ss:$36 sps:$4 sm:$0xff]   ;;  %v3323_v13 = vld [vmem:[#allocation5 + $0x4c] ss:$36 sps:$4 sm:$0xff]   ;;  %v3326_v15 = vld [vmem:[#allocation5 + $0x4] ss:$36 sps:$4 sm:$0xff]  }
  0x51   : > { %v3322_v12 = vld [vmem:[#allocation5 + $0x90] ss:$36 sps:$4 sm:$0xff]   ;;  %v3325_v14 = vld [vmem:[#allocation5 + $0x48] ss:$36 sps:$4 sm:$0xff]   ;;  %v3328_v16 = vld [vmem:[#allocation5] ss:$36 sps:$4 sm:$0xff]  }
  0x52   : > { %v3746_v17 = vld [vmem:[%s3733_s29] sm:$0xff]   ;;  %v3336_v20 = vld [vmem:[#allocation5 + $0x20c] ss:$36 sps:$4 sm:$0xff]   ;;  %v3337_v24 = vld [vmem:[#allocation5 + $0x1b8] ss:$36 sps:$4 sm:$0xff]   ;;  %s5075_s23 = scalar_lea.vmem [#allocation7], %s2895_s27 }
  0x53   : > { %784 = vmatpush1.bf16.msra.mxu0 %v3310_v4  ;;  %3234 = vmatpush1.bf16.msra.mxu1 %v3310_v4  ;;  %v3749_v18 = vld [vmem:[%s3733_s29 + $0x60] sm:$0xff]   ;;  %v3334_v22 = vld [vmem:[#allocation5 + $0x208] ss:$36 sps:$4 sm:$0xff]   ;;  %v3344_v28 = vld [vmem:[#allocation5 + $0x174] ss:$36 sps:$4 sm:$0xff]   ;;  %s3057_s25 = sshll.u32 %s3633_s16, 11 }
  0x54   : > { %785 = vmatprep.subr.bf16.mxu0 %v3311_v5  ;;  %3227 = vmatprep.subr.bf16.mxu1 %v3311_v5  ;;  %v3333_v19 = vld [vmem:[#allocation5 + $0x204] ss:$36 sps:$4 sm:$0xff]   ;;  %v3339_v23 = vld [vmem:[#allocation5 + $0x1bc] ss:$36 sps:$4 sm:$0xff]   ;;  %v3342_v31 = vld [vmem:[#allocation5 + $0x170] ss:$36 sps:$4 sm:$0xff]   ;;  %s5407_s8 = scalar_lea.hbm %s5456_s3, %s3057_s25 }
  0x55   : > { %v3331_v21 = vld [vmem:[#allocation5 + $0x200] ss:$36 sps:$4 sm:$0xff]   ;;  %v3757_v27 = vld [vmem:[%s3733_s29 + $0x68] sm:$0xff]   ;;  %v3364_v33 = vld [vmem:[#allocation5 + $0x178] ss:$36 sps:$4 sm:$0xff]   ;;  %s2804_s30 = sshll.u32 %s5075_s23, 4  ;;  %s5409_s30 = int_to_ptr.vmem [resolvable:$true] %s2804_s30 }
  0x56   : > { %v3350_v25 = vld [vmem:[#allocation5 + $0x1c4] ss:$36 sps:$4 sm:$0xff]   ;;  %v3366_v30 = vld [vmem:[#allocation5 + $0x17c] ss:$36 sps:$4 sm:$0xff]   ;;  %v3347_v32 = vld [vmem:[#allocation5 + $0x12c] ss:$36 sps:$4 sm:$0xff]  }
  0x57   : > { %786 = vmatpush1.bf16.msra.mxu0 %v3313_v6  ;;  %3235 = vmatpush1.bf16.msra.mxu1 %v3313_v6  ;;  %v3348_v29 = vld [vmem:[#allocation5 + $0x1c0] ss:$36 sps:$4 sm:$0xff]   ;;  %v3345_v34 = vld [vmem:[#allocation5 + $0x128] ss:$36 sps:$4 sm:$0xff]   ;;  %v3376_v35 = vld [vmem:[#allocation5 + $0x134] ss:$36 sps:$4 sm:$0xff]  }
  0x58   : > { %787 = vmatprep.subr.bf16.mxu0 %v3314_v7  ;;  %3228 = vmatprep.subr.bf16.mxu1 %v3314_v7  ;;  %v3765_v36 = vld [vmem:[%s3733_s29 + $0x10] sm:$0xff]   ;;  %v3355_v38 = vld [vmem:[#allocation5 + $0xe4] ss:$36 sps:$4 sm:$0xff]   ;;  %v3358_v41 = vld [vmem:[#allocation5 + $0x9c] ss:$36 sps:$4 sm:$0xff]   ;;  %s2791_s16 = scalar_lea.sflag [#allocation4], %s3727_s26 }
  0x59   : > { %v3768_v37 = vld [vmem:[%s3733_s29 + $0x70] sm:$0xff]   ;;  %v3353_v40 = vld [vmem:[#allocation5 + $0xe0] ss:$36 sps:$4 sm:$0xff]   ;;  %v3356_v42 = vld [vmem:[#allocation5 + $0x98] ss:$36 sps:$4 sm:$0xff]   ;;  %s3512_s9 = scalar_lea.vmem %s5409_s30, 2048 }
  0x5a   : > { %v3374_v39 = vld [vmem:[#allocation5 + $0x130] ss:$36 sps:$4 sm:$0xff]   ;;  %v3772_v43 = vld [vmem:[%s3733_s29 + $0x18] sm:$0xff]   ;;  %v3382_v47 = vld [vmem:[#allocation5 + $0xe8] ss:$36 sps:$4 sm:$0xff]   ;;  %p3513_p3 = scmp.ne.s32.totalorder %s5409_s30, %s3512_s9  ;;  %p5714_p10 = scmp.ne.s32.totalorder %s5494_s6, 0 }
  0x5b   : > { %788 = vmatpush1.bf16.msra.mxu0 %v3316_v8  ;;  %3236 = vmatpush1.bf16.msra.mxu1 %v3316_v8  ;;  %v3775_v44 = vld [vmem:[%s3733_s29 + $0x78] sm:$0xff]   ;;  %v3384_v45 = vld [vmem:[#allocation5 + $0xec] ss:$36 sps:$4 sm:$0xff]   ;;  %v3388_v48 = vld [vmem:[#allocation5 + $0xa4] ss:$36 sps:$4 sm:$0xff]   ;;  %s3589_s10 = smov [#allocation7]  }
  0x5c   : > { %789 = vmatprep.subr.bf16.mxu0 %v3317_v9  ;;  %3229 = vmatprep.subr.bf16.mxu1 %v3317_v9  ;;  %v3363_v46 = vld [vmem:[#allocation5 + $0x54] ss:$36 sps:$4 sm:$0xff]   ;;  %v3369_v50 = vld [vmem:[#allocation5 + $0xc] ss:$36 sps:$4 sm:$0xff]   ;;  %v3386_v51 = vld [vmem:[#allocation5 + $0xa0] ss:$36 sps:$4 sm:$0xff]   ;;  %p3514_p7 = pnand %p3513_p3, %p5714_p10 }
  0x5d   : > { %v3361_v49 = vld [vmem:[#allocation5 + $0x50] ss:$36 sps:$4 sm:$0xff]   ;;  %v3396_v52 = vld [vmem:[#allocation5 + $0x5c] ss:$36 sps:$4 sm:$0xff]   ;;  %v3367_v53 = vld [vmem:[#allocation5 + $0x8] ss:$36 sps:$4 sm:$0xff]  }
  0x5e   : > { %v3785_v54 = vld [vmem:[%s3733_s29 + $0x20] sm:$0xff]   ;;  %v3373_v55 = vld [vmem:[#allocation5 + $0x214] ss:$36 sps:$4 sm:$0xff]   ;;  %v3381_v58 = vld [vmem:[#allocation5 + $0x1cc] ss:$36 sps:$4 sm:$0xff]   ;;  %p3515_p11 = pneg %p3514_p7  ;;  %s3516_s11 = sshll.u32 %s3589_s10, 4  ;;  %s3517_s11 = int_to_ptr.vmem [resolvable:$false] %s3516_s11 }
  0x5f   : > { %790 = vmatpush1.bf16.msra.mxu0 %v3319_v10  ;;  %3237 = vmatpush1.bf16.msra.mxu1 %v3319_v10  ;;  %v3394_v56 = vld [vmem:[#allocation5 + $0x58] ss:$36 sps:$4 sm:$0xff]   ;;  %v3371_v57 = vld [vmem:[#allocation5 + $0x210] ss:$36 sps:$4 sm:$0xff]   ;;  %v3792_v61 = vld [vmem:[%s3733_s29 + $0x28] sm:$0xff]   ;;  %s3518_s21 = scalar_lea.vmem %s3517_s11, 4096  ;;  %p3519_p12 = scmp.lt.s32.totalorder %s5409_s30, %s3517_s11 }
  0x60   : > { %791 = vmatprep.subr.bf16.mxu0 %v3320_v11  ;;  %3230 = vmatprep.subr.bf16.mxu1 %v3320_v11  ;;  %v3403_v59 = vld [vmem:[#allocation5 + $0x14] ss:$36 sps:$4 sm:$0xff]   ;;  %v3379_v62 = vld [vmem:[#allocation5 + $0x1c8] ss:$36 sps:$4 sm:$0xff]   ;;  %v3390_v2 = vld [vmem:[#allocation5 + $0x180] ss:$36 sps:$4 sm:$0xff]   ;;  %p3520_p2 = scmp.lt.s32.totalorder %s3518_s21, %s3512_s9 }
  0x61   : > { %v3401_v60 = vld [vmem:[#allocation5 + $0x10] ss:$36 sps:$4 sm:$0xff]   ;;  %v3794_v63 = vld [vmem:[#allocation5 + $0x218] ss:$36 sps:$4 sm:$0xff]   ;;  %v3392_v1 = vld [vmem:[#allocation5 + $0x184] ss:$36 sps:$4 sm:$0xff]  }
  0x62   : > { %v3400_v3 = vld [vmem:[#allocation5 + $0x13c] ss:$36 sps:$4 sm:$0xff]   ;;  %v3803_v4 = vld [vmem:[%s3733_s29 + $0x30] sm:$0xff]   ;;  %v3409_v10 = vld [vmem:[#allocation5 + $0xa8] ss:$36 sps:$4 sm:$0xff]   ;;  %p3521_p13 = por %p3520_p2, %p3519_p12 }
  0x63   : > { %792 = vmatpush1.bf16.msra.mxu0 %v3322_v12  ;;  %3238 = vmatpush1.bf16.msra.mxu1 %v3322_v12  ;;  %v3398_v5 = vld [vmem:[#allocation5 + $0x138] ss:$36 sps:$4 sm:$0xff]   ;;  %v3405_v7 = vld [vmem:[#allocation5 + $0xf0] ss:$36 sps:$4 sm:$0xff]   ;;  %v3415_v11 = vld [vmem:[#allocation5 + $0x64] ss:$36 sps:$4 sm:$0xff]  }
  0x64   : > { %793 = vmatprep.subr.bf16.mxu0 %v3323_v13  ;;  %3231 = vmatprep.subr.bf16.mxu1 %v3323_v13  ;;  %v3407_v6 = vld [vmem:[#allocation5 + $0xf4] ss:$36 sps:$4 sm:$0xff]   ;;  %v3411_v8 = vld [vmem:[#allocation5 + $0xac] ss:$36 sps:$4 sm:$0xff]   ;;  %v3413_v12 = vld [vmem:[#allocation5 + $0x60] ss:$36 sps:$4 sm:$0xff]   ;;  %p3522_p0 = pnand %p3521_p13, %p3515_p11 }
  0x65   : > { %v3810_v9 = vld [vmem:[%s3733_s29 + $0x38] sm:$0xff]  }
  0x66   : > { %v3419_v13 = vld [vmem:[#allocation5 + $0x1c] ss:$36 sps:$4 sm:$0xff]  }
  0x67   : > { %794 = vmatpush1.bf16.msra.mxu0 %v3325_v14  ;;  %3239 = vmatpush1.bf16.msra.mxu1 %v3325_v14  ;;  %v3817_v14 = vld [vmem:[%s3733_s29 + $0x40] sm:$0xff]  }
  0x68   : > { %795 = vmatprep.subr.bf16.mxu0 %v3326_v15  ;;  %3232 = vmatprep.subr.bf16.mxu1 %v3326_v15  ;;  %v3417_v15 = vld [vmem:[#allocation5 + $0x18] ss:$36 sps:$4 sm:$0xff]  }
  0x6b   : > { %796 = vmatpush1.bf16.msra.mxu0 %v3328_v16  ;;  %3240 = vmatpush1.bf16.msra.mxu1 %v3328_v16  ;;  %v3824_v16 = vld [vmem:[%s3733_s29 + $0x48] sm:$0xff]  }
  0x6c   : > { %971 = vmatprep.subr.bf16.mxu1 %v3333_v19  ;;  %1163 = vmatprep.subr.bf16.mxu0 %v3336_v20  ;;  %v3831_v19 = vld [vmem:[%s3733_s29 + $0x50] sm:$0xff]   ;;  %v3838_v20 = vld [vmem:[%s3733_s29 + $0x58] sm:$0xff]  }
  0x6e   : > { %814 = vmatmul.mubr.bf16.vlgmr.msra.gmra.mxu0 %v3746_v17  ;;  %934 = vmatmul.mubr.bf16.vlgmr.msra.gmra.mxu1 %v3749_v18 }
  0x6f   : > { %972 = vmatpush1.bf16.msra.mxu1 %v3331_v21  ;;  %1164 = vmatpush1.bf16.msra.mxu0 %v3334_v22  ;;  %v3412_v21 = vld [vmem:[#allocation5 + $0x1d0] ss:$36 sps:$4 sm:$0xff]   ;;  %v3416_v22 = vld [vmem:[#allocation5 + $0x188] ss:$36 sps:$4 sm:$0xff]  }
  0x70   : > { %973 = vmatprep.subr.bf16.mxu1 %v3339_v23  ;;  %823 = vmatprep.mubr.bf16.mxu0 %v5463_v0  ;;  %v3420_v23 = vld [vmem:[#allocation5 + $0x140] ss:$36 sps:$4 sm:$0xff]  }
  0x71   : > { %943 = vmatprep.mubr.bf16.mxu1 %v5463_v0  ;;  %1165 = vmatprep.subr.bf16.mxu0 %v3350_v25  ;;  %v3422_v25 = vld [vmem:[#allocation5 + $0xb0] ss:$36 sps:$4 sm:$0xff]  }
  0x73   : > { %974 = vmatpush1.bf16.msra.mxu1 %v3337_v24  ;;  %1166 = vmatpush1.bf16.msra.mxu0 %v3348_v29  ;;  %v3421_v24 = vld [vmem:[#allocation5 + $0xf8] ss:$36 sps:$4 sm:$0xff]   ;;  %v3424_v29 = vld [vmem:[#allocation5 + $0x20] ss:$36 sps:$4 sm:$0xff]  }
  0x74   : > { %975 = vmatprep.subr.bf16.mxu1 %v3344_v28  ;;  %1167 = vmatprep.subr.bf16.mxu0 %v3366_v30  ;;  %v3423_v28 = vld [vmem:[#allocation5 + $0x68] ss:$36 sps:$4 sm:$0xff]   ;;  %v1706_v30 = vlaneseq }
  0x76   : > { %824 = vmatmul.mubr.bf16.gmra.mxu0 %v3754_v26  ;;  %944 = vmatmul.mubr.bf16.gmra.mxu1 %v3757_v27 }
  0x77   : > { %976 = vmatpush1.bf16.msra.mxu1 %v3342_v31  ;;  %833 = vmatprep.mubr.bf16.mxu0 %v5463_v0 }
  0x78   : > { %977 = vmatprep.subr.bf16.mxu1 %v3347_v32  ;;  %953 = vmatprep.mubr.bf16.mxu1 %v5463_v0 }
  0x79   : > { %1168 = vmatpush1.bf16.msra.mxu0 %v3364_v33  ;;  %v3899_v33 = vshrl.u32 %v1706_v30, 7 }
  0x7a   : > { %1169 = vmatprep.subr.bf16.mxu0 %v3376_v35 }
  0x7b   : > { %978 = vmatpush1.bf16.msra.mxu1 %v3345_v34  ;;  %vm1783_vm0 = vcmp.lt.s32.totalorder %v3899_v33, 1  ;;  %vm1939_vm1 = vcmp.lt.s32.totalorder %v3899_v33, 7  ;;  %vm1709_vm2 = vcmp.ge.s32.totalorder %v3899_v33, 1 }
  0x7c   : > { %979 = vmatprep.subr.bf16.mxu1 %v3355_v38 }
  0x7d   : > { %1170 = vmatpush1.bf16.msra.mxu0 %v3374_v39 }
  0x7e   : > { %834 = vmatmul.mubr.bf16.gmra.mxu0 %v3765_v36  ;;  %954 = vmatmul.mubr.bf16.gmra.mxu1 %v3768_v37 }
  0x7f   : > { %980 = vmatpush1.bf16.msra.mxu1 %v3353_v40  ;;  %843 = vmatprep.mubr.bf16.mxu0 %v5463_v0 }
  0x80   : > { %981 = vmatprep.subr.bf16.mxu1 %v3358_v41  ;;  %963 = vmatprep.mubr.bf16.mxu1 %v5463_v0 }
  0x81   : > { %1171 = vmatprep.subr.bf16.mxu0 %v3384_v45 }
  0x82   : > { %1172 = vmatpush1.bf16.msra.mxu0 %v3382_v47 }
  0x83   : > { %982 = vmatpush1.bf16.msra.mxu1 %v3356_v42  ;;  %1173 = vmatprep.subr.bf16.mxu0 %v3388_v48 }
  0x84   : > { %983 = vmatprep.subr.bf16.mxu1 %v3363_v46 }
  0x86   : > { %844 = vmatmul.mubr.bf16.gmra.mxu0 %v3772_v43  ;;  %964 = vmatmul.mubr.bf16.gmra.mxu1 %v3775_v44 }
  0x87   : > { %984 = vmatpush1.bf16.msra.mxu1 %v3361_v49  ;;  %853 = vmatprep.mubr.bf16.mxu0 %v5463_v0 }
  0x88   : > { %985 = vmatprep.subr.bf16.mxu1 %v3369_v50  ;;  %1003 = vmatprep.mubr.bf16.mxu1 %v5463_v0 }
  0x89   : > { %1174 = vmatpush1.bf16.msra.mxu0 %v3386_v51 }
  0x8a   : > { %1175 = vmatprep.subr.bf16.mxu0 %v3396_v52 }
  0x8b   : > { %986 = vmatpush1.bf16.msra.mxu1 %v3367_v53 }
  0x8c   : > { %1356 = vmatprep.subr.bf16.mxu1 %v3373_v55 }
  0x8d   : > { %1176 = vmatpush1.bf16.msra.mxu0 %v3394_v56 }
  0x8e   : > { %854 = vmatmul.mubr.bf16.gmra.mxu0 %v3785_v54  ;;  %1004 = vmatmul.mubr.bf16.vlgmr.msra.gmra.mxu1 %v3746_v17 }
  0x8f   : > { %1357 = vmatpush1.bf16.msra.mxu1 %v3371_v57  ;;  %863 = vmatprep.mubr.bf16.mxu0 %v5463_v0 }
  0x90   : > { %1013 = vmatprep.mubr.bf16.mxu1 %v5463_v0  ;;  %1358 = vmatprep.subr.bf16.mxu1 %v3381_v58 }
  0x91   : > { %1177 = vmatprep.subr.bf16.mxu0 %v3403_v59 }
  0x92   : > { %1178 = vmatpush1.bf16.msra.mxu0 %v3401_v60 }
  0x93   : > { %1359 = vmatpush1.bf16.msra.mxu1 %v3379_v62  ;;  %3177 = vmatprep.subr.bf16.mxu0 %v3794_v63 }
  0x94   : > { %1360 = vmatprep.subr.bf16.mxu1 %v3392_v1 }
  0x96   : > { %864 = vmatmul.mubr.bf16.gmra.mxu0 %v3792_v61  ;;  %1014 = vmatmul.mubr.bf16.gmra.mxu1 %v3754_v26 }
  0x97   : > { %873 = vmatprep.mubr.bf16.mxu0 %v5463_v0  ;;  %1023 = vmatprep.mubr.bf16.mxu1 %v5463_v0 }
  0x98   : > { %1361 = vmatpush1.bf16.msra.mxu1 %v3390_v2 }
  0x99   : > { %1362 = vmatprep.subr.bf16.mxu1 %v3400_v3 }
  0x9c   : > { %1363 = vmatpush1.bf16.msra.mxu1 %v3398_v5 }
  0x9d   : > { %1364 = vmatprep.subr.bf16.mxu1 %v3407_v6 }
  0x9e   : > { %874 = vmatmul.mubr.bf16.gmra.mxu0 %v3803_v4  ;;  %1024 = vmatmul.mubr.bf16.gmra.mxu1 %v3765_v36 }
  0x9f   : > { %883 = vmatprep.mubr.bf16.mxu0 %v5463_v0  ;;  %1033 = vmatprep.mubr.bf16.mxu1 %v5463_v0 }
  0xa0   : > { %1365 = vmatpush1.bf16.msra.mxu1 %v3405_v7 }
  0xa1   : > { %1366 = vmatprep.subr.bf16.mxu1 %v3411_v8 }
  0xa4   : > { %1367 = vmatpush1.bf16.msra.mxu1 %v3409_v10 }
  0xa5   : > { %1368 = vmatprep.subr.bf16.mxu1 %v3415_v11 }
  0xa6   : > { %884 = vmatmul.mubr.bf16.gmra.mxu0 %v3810_v9  ;;  %1034 = vmatmul.mubr.bf16.gmra.mxu1 %v3772_v43 }
  0xa7   : > { %893 = vmatprep.mubr.bf16.mxu0 %v5463_v0  ;;  %1043 = vmatprep.mubr.bf16.mxu1 %v5463_v0 }
  0xa8   : > { %1369 = vmatpush1.bf16.msra.mxu1 %v3413_v12 }
  0xa9   : > { %1370 = vmatprep.subr.bf16.mxu1 %v3419_v13 }
  0xac   : > { %1371 = vmatpush1.bf16.msra.mxu1 %v3417_v15 }
  0xae   : > { %894 = vmatmul.mubr.bf16.gmra.mxu0 %v3817_v14  ;;  %1044 = vmatmul.mubr.bf16.gmra.mxu1 %v3785_v54 }
  0xaf   : > { %903 = vmatprep.mubr.bf16.mxu0 %v5463_v0  ;;  %1053 = vmatprep.mubr.bf16.mxu1 %v5463_v0 }
  0xb6   : > { %904 = vmatmul.mubr.bf16.gmra.mxu0 %v3824_v16  ;;  %1054 = vmatmul.mubr.bf16.gmra.mxu1 %v3792_v61 }
  0xb7   : > { %913 = vmatprep.mubr.bf16.mxu0 %v5463_v0  ;;  %1063 = vmatprep.mubr.bf16.mxu1 %v5463_v0 }
  0xbe   : > { %914 = vmatmul.mubr.bf16.gmra.mxu0 %v3831_v19  ;;  %1064 = vmatmul.mubr.bf16.gmra.mxu1 %v3803_v4 }
  0xbf   : > { %923 = vmatprep.mubr.bf16.mxu0 %v5463_v0  ;;  %1073 = vmatprep.mubr.bf16.mxu1 %v5463_v0 }
  0xc6   : > { %924 = vmatmul.mubr.bf16.gmra.mxu0 %v3838_v20  ;;  %1074 = vmatmul.mubr.bf16.gmra.mxu1 %v3810_v9 }
  0xc7   : > { %1083 = vmatprep.mubr.bf16.mxu1 %v5463_v0  ;;  %1195 = vmatprep.mubr.bf16.mxu0 %v5463_v0 }
  0xce   : > { %1084 = vmatmul.mubr.bf16.gmra.mxu1 %v3817_v14  ;;  %1196 = vmatmul.mubr.bf16.vlgmr.msra.gmra.mxu0 %v3746_v17 }
  0xcf   : > { %3178 = vmatpush3.bf16.msra.mxu0 %v3794_v63  ;;  %1093 = vmatprep.mubr.bf16.mxu1 %v5463_v0 }
  0xd0   : > { %1205 = vmatprep.mubr.bf16.mxu0 %v5463_v0  ;;  %3179 = vmatprep.subr.bf16.mxu0 %v3412_v21 }
  0xd3   : > { %3180 = vmatpush3.bf16.msra.mxu0 %v3412_v21 }
  0xd4   : > { %3181 = vmatprep.subr.bf16.mxu0 %v3416_v22 }
  0xd6   : > { %1094 = vmatmul.mubr.bf16.gmra.mxu1 %v3824_v16  ;;  %1206 = vmatmul.mubr.bf16.gmra.mxu0 %v3754_v26 }
  0xd7   : > { %1103 = vmatprep.mubr.bf16.mxu1 %v5463_v0  ;;  %1215 = vmatprep.mubr.bf16.mxu0 %v5463_v0 }
  0xd8   : > { %3182 = vmatpush3.bf16.msra.mxu0 %v3416_v22 }
  0xd9   : > { %3183 = vmatprep.subr.bf16.mxu0 %v3420_v23 }
  0xdc   : > { %3184 = vmatpush3.bf16.msra.mxu0 %v3420_v23 }
  0xdd   : > { %3185 = vmatprep.subr.bf16.mxu0 %v3421_v24 }
  0xde   : > { %1104 = vmatmul.mubr.bf16.gmra.mxu1 %v3831_v19  ;;  %1216 = vmatmul.mubr.bf16.gmra.mxu0 %v3765_v36 }
  0xdf   : > { %1113 = vmatprep.mubr.bf16.mxu1 %v5463_v0  ;;  %1225 = vmatprep.mubr.bf16.mxu0 %v5463_v0 }
  0xe0   : > { %3186 = vmatpush3.bf16.msra.mxu0 %v3421_v24 }
  0xe1   : > { %3187 = vmatprep.subr.bf16.mxu0 %v3422_v25 }
  0xe4   : > { %3188 = vmatpush3.bf16.msra.mxu0 %v3422_v25 }
  0xe5   : > { %3189 = vmatprep.subr.bf16.mxu0 %v3423_v28 }
  0xe6   : > { %1114 = vmatmul.mubr.bf16.gmra.mxu1 %v3838_v20  ;;  %1226 = vmatmul.mubr.bf16.gmra.mxu0 %v3772_v43 }
  0xe7   : > { %1123 = vmatprep.mubr.bf16.mxu1 %v5463_v0  ;;  %1235 = vmatprep.mubr.bf16.mxu0 %v5463_v0 }
  0xe8   : > { %3190 = vmatpush3.bf16.msra.mxu0 %v3423_v28 }
  0xe9   : > { %3191 = vmatprep.subr.bf16.mxu0 %v3424_v29 }
  0xec   : > { %3192 = vmatpush3.bf16.msra.mxu0 %v3424_v29 }
  0xee   : > { %1124 = vmatmul.mubr.bf16.gmra.mxu1 %v3749_v18  ;;  %1236 = vmatmul.mubr.bf16.gmra.mxu0 %v3785_v54 }
  0xef   : > { %1133 = vmatprep.mubr.bf16.mxu1 %v5463_v0  ;;  %1245 = vmatprep.mubr.bf16.mxu0 %v5463_v0 }
  0xf6   : > { %1134 = vmatmul.mubr.bf16.gmra.mxu1 %v3757_v27  ;;  %1246 = vmatmul.mubr.bf16.gmra.mxu0 %v3792_v61 }
  0xf7   : > { %1143 = vmatprep.mubr.bf16.mxu1 %v5463_v0  ;;  %1255 = vmatprep.mubr.bf16.mxu0 %v5463_v0 }
  0xfe   : > { %1144 = vmatmul.mubr.bf16.gmra.mxu1 %v3768_v37  ;;  %1256 = vmatmul.mubr.bf16.gmra.mxu0 %v3803_v4 }
  0xff   : > { %1153 = vmatprep.mubr.bf16.mxu1 %v5463_v0  ;;  %1265 = vmatprep.mubr.bf16.mxu0 %v5463_v0 }
 0x106   : > { %1154 = vmatmul.mubr.bf16.gmra.mxu1 %v3775_v44  ;;  %1266 = vmatmul.mubr.bf16.gmra.mxu0 %v3810_v9 }
 0x107   : > { %1275 = vmatprep.mubr.bf16.mxu0 %v5463_v0  ;;  %1388 = vmatprep.mubr.bf16.mxu1 %v5463_v0 }
 0x10e   : > { %1276 = vmatmul.mubr.bf16.gmra.mxu0 %v3817_v14  ;;  %1389 = vmatmul.mubr.bf16.vlgmr.msra.gmra.mxu1 %v3746_v17 }
 0x10f   : > { %1285 = vmatprep.mubr.bf16.mxu0 %v5463_v0  ;;  %1395 = vmatprep.mubr.bf16.mxu1 %v5463_v0 }
 0x116   : > { %1286 = vmatmul.mubr.bf16.gmra.mxu0 %v3824_v16  ;;  %1396 = vmatmul.mubr.bf16.gmra.mxu1 %v3754_v26 }
 0x117   : > { %1295 = vmatprep.mubr.bf16.mxu0 %v5463_v0  ;;  %1405 = vmatprep.mubr.bf16.mxu1 %v5463_v0 }
 0x11e   : > { %1296 = vmatmul.mubr.bf16.gmra.mxu0 %v3831_v19  ;;  %1406 = vmatmul.mubr.bf16.gmra.mxu1 %v3765_v36 }
 0x11f   : > { %1305 = vmatprep.mubr.bf16.mxu0 %v5463_v0  ;;  %1415 = vmatprep.mubr.bf16.mxu1 %v5463_v0 }
 0x126   : > { %1306 = vmatmul.mubr.bf16.gmra.mxu0 %v3838_v20  ;;  %1416 = vmatmul.mubr.bf16.gmra.mxu1 %v3772_v43 }
 0x127   : > { %1315 = vmatprep.mubr.bf16.mxu0 %v5463_v0  ;;  %1425 = vmatprep.mubr.bf16.mxu1 %v5463_v0 }
 0x12e   : > { %v3893_v31 = vpop.f32.mrf.mxu0  ;;  %v3895_v32 = vpop.f32.mrf.mxu1  ;;  %1316 = vmatmul.mubr.bf16.gmra.mxu0 %v3749_v18  ;;  %1426 = vmatmul.mubr.bf16.gmra.mxu1 %v3785_v54 }
 0x12f   : > { %1325 = vmatprep.mubr.bf16.mxu0 %v5463_v0  ;;  %1435 = vmatprep.mubr.bf16.mxu1 %v5463_v0  ;;  %v1752_v40 = vrot.slane %v3893_v31, 7  ;;  %v5462_v41 = vrot.slane %v3895_v32, 7 }
 0x130   : > { %v3903_v34 = vpop.f32.mrf.mxu0  ;;  %v3905_v35 = vpop.f32.mrf.mxu1 }
 0x131   : > { %5500 = vst [vmem:[#allocation11_spill] sm:$0xff] %v3905_v35 }
 0x132   : > { %v819_v38 = vpop.f32.mrf.mxu0  ;;  %v939_v39 = vpop.f32.mrf.mxu1 }
 0x133   : > { %v1753_v42 = vrot.slane %v819_v38, 7  ;;  %v1777_v45 = vrot.slane %v939_v39, 7 }
 0x134   : > { %v3910_v46 = vpop.f32.mrf.mxu0  ;;  %v3912_v47 = vpop.f32.mrf.mxu1 }
 0x135   : > { %5501 = vst [vmem:[#allocation12_spill] sm:$0xff] %v3912_v47  ;;  %v3918_v48 = vsel %vm1783_vm0, %v1752_v40, %v1753_v42  ;;  %v3924_v49 = vsel %vm1783_vm0, %v5462_v41, %v1777_v45 }
 0x136   : > { %5502 = vst [vmem:[#allocation13_spill] sm:$0xff] %v3924_v49  ;;  %v825_v50 = vpop.f32.mrf.mxu0  ;;  %v945_v51 = vpop.f32.mrf.mxu1  ;;  %1326 = vmatmul.mubr.bf16.gmra.mxu0 %v3757_v27  ;;  %1436 = vmatmul.mubr.bf16.gmra.mxu1 %v3792_v61 }
 0x137   : > { %v1754_v52 = vrot.slane %v825_v50, 7  ;;  %v1778_v53 = vrot.slane %v945_v51, 7  ;;  %1335 = vmatprep.mubr.bf16.mxu0 %v5463_v0  ;;  %1445 = vmatprep.mubr.bf16.mxu1 %v5463_v0 }
 0x138   : > { %v3930_v55 = vpop.f32.mrf.mxu0  ;;  %v3932_v56 = vpop.f32.mrf.mxu1 }
 0x139   : > { %5503 = vst [vmem:[#allocation14_spill] sm:$0xff] %v3932_v56  ;;  %v3936_v57 = vsel %vm1783_vm0, %v1753_v42, %v1754_v52  ;;  %v3940_v58 = vsel %vm1783_vm0, %v1777_v45, %v1778_v53 }
 0x13a   : > { %5504 = vst [vmem:[#allocation15_spill] sm:$0xff] %v3940_v58  ;;  %v829_v59 = vpop.f32.mrf.mxu0  ;;  %v949_v60 = vpop.f32.mrf.mxu1 }
 0x13b   : > { %v1755_v62 = vrot.slane %v829_v59, 7  ;;  %v1779_v63 = vrot.slane %v949_v60, 7 }
 0x13c   : > { %v3942_v1 = vpop.f32.mrf.mxu0  ;;  %v3944_v2 = vpop.f32.mrf.mxu1 }
 0x13d   : > { %5505 = vst [vmem:[#allocation16_spill] sm:$0xff] %v3944_v2  ;;  %v3948_v3 = vsel %vm1783_vm0, %v1754_v52, %v1755_v62  ;;  %v3952_v5 = vsel %vm1783_vm0, %v1778_v53, %v1779_v63 }
 0x13e   : > { %5506 = vst [vmem:[#allocation17_spill] sm:$0xff] %v3952_v5  ;;  %v835_v6 = vpop.f32.mrf.mxu0  ;;  %v955_v7 = vpop.f32.mrf.mxu1  ;;  %1336 = vmatmul.mubr.bf16.gmra.mxu0 %v3768_v37  ;;  %1446 = vmatmul.mubr.bf16.gmra.mxu1 %v3803_v4 }
 0x13f   : > { %v1756_v8 = vrot.slane %v835_v6, 7  ;;  %v1780_v10 = vrot.slane %v955_v7, 7  ;;  %1345 = vmatprep.mubr.bf16.mxu0 %v5463_v0  ;;  %1455 = vmatprep.mubr.bf16.mxu1 %v5463_v0 }
 0x140   : > { %v3958_v11 = vpop.f32.mrf.mxu0  ;;  %v3960_v12 = vpop.f32.mrf.mxu1 }
 0x141   : > { %5507 = vst [vmem:[#allocation18_spill] sm:$0xff] %v3960_v12  ;;  %v3964_v13 = vsel %vm1783_vm0, %v1755_v62, %v1756_v8  ;;  %v3968_v15 = vsel %vm1783_vm0, %v1779_v63, %v1780_v10  ;;  %v5514_v12 = vmov 0  }
 0x142   : > { %5508 = vst [vmem:[#allocation19_spill] sm:$0xff] %v3968_v15  ;;  %v839_v21 = vpop.f32.mrf.mxu0  ;;  %v959_v22 = vpop.f32.mrf.mxu1 }
 0x143   : > { %v1757_v23 = vrot.slane %v839_v21, 7  ;;  %v1781_v24 = vrot.slane %v959_v22, 7 }
 0x144   : > { %v3970_v25 = vpop.f32.mrf.mxu0  ;;  %v3972_v28 = vpop.f32.mrf.mxu1 }
 0x145   : > { %5509 = vst [vmem:[#allocation20_spill] sm:$0xff] %v3972_v28  ;;  %v3976_v29 = vsel %vm1783_vm0, %v1756_v8, %v1757_v23  ;;  %v3980_v30 = vsel %vm1783_vm0, %v1780_v10, %v1781_v24 }
 0x146   : > { %5510 = vst [vmem:[#allocation21_spill] sm:$0xff] %v3980_v30  ;;  %v845_v38 = vpop.f32.mrf.mxu0  ;;  %v965_v39 = vpop.f32.mrf.mxu1  ;;  %1346 = vmatmul.mubr.bf16.gmra.mxu0 %v3775_v44  ;;  %1456 = vmatmul.mubr.bf16.gmra.mxu1 %v3810_v9 }
 0x147   : > { %v1758_v42 = vrot.slane %v845_v38, 7  ;;  %1465 = vmatprep.mubr.bf16.mxu1 %v5463_v0  ;;  %3193 = vmatprep.mubr.bf16.mxu0 %v3746_v17 }
 0x148   : > { %v3986_v45 = vpop.f32.mrf.mxu0  ;;  %v966_v50 = vpop.f32.mrf.mxu1 }
 0x149   : > { %v3990_v51 = vsel %vm1783_vm0, %v1757_v23, %v1758_v42 }
 0x14a   : > { %v849_v52 = vpop.f32.mrf.mxu0  ;;  %v967_v53 = vpop.f32.mrf.mxu1 }
 0x14b   : > { %v1759_v59 = vrot.slane %v849_v52, 7  ;;  %v1782_v60 = vrot.slane %v967_v53, 7 }
 0x14c   : > { %v3992_v62 = vpop.f32.mrf.mxu0  ;;  %v969_v63 = vpop.f32.mrf.mxu1 }
 0x14d   : > { %v3998_v6 = vsel %vm1783_vm0, %v1782_v60, %v1752_v40  ;;  %v4002_v17 = vsel %vm1783_vm0, %v1758_v42, %v1759_v59 }
 0x14e   : > { %v855_v7 = vpop.f32.mrf.mxu0  ;;  %v1005_v8 = vpop.f32.mrf.mxu1  ;;  %1466 = vmatmul.mubr.bf16.gmra.mxu1 %v3817_v14  ;;  %3194 = vmatmul.mubr.bf16.vlgmr.msra.gmra.mxu0 %v3754_v26 }
 0x14f   : > { %v1760_v10 = vrot.slane %v855_v7, 7  ;;  %1475 = vmatprep.mubr.bf16.mxu1 %v5463_v0  ;;  %3197 = vmatprep.mubr.bf16.mxu0 %v3765_v36  ;;  %v1908_v24 = vrot.slane %v1005_v8, 1 }
 0x150   : > { %v4008_v31 = vpop.f32.mrf.mxu0  ;;  %v4010_v21 = vpop.f32.mrf.mxu1 }
 0x151   : > { %5511 = vst [vmem:[#allocation22_spill] sm:$0xff] %v4010_v21  ;;  %v4014_v40 = vsel %vm1783_vm0, %v1759_v59, %v1760_v10  ;;  %v5461_v36 = vrot.slane %v4010_v21, 7 }
 0x152   : > { %v859_v22 = vpop.f32.mrf.mxu0  ;;  %v1009_v23 = vpop.f32.mrf.mxu1 }
 0x153   : > { %v1761_v38 = vrot.slane %v859_v22, 7  ;;  %v1909_v26 = vrot.slane %v1009_v23, 1 }
 0x154   : > { %v4017_v39 = vpop.f32.mrf.mxu0  ;;  %v1011_v42 = vpop.f32.mrf.mxu1 }
 0x155   : > { %v4022_v50 = vsel %vm1939_vm1, %v1908_v24, %v1909_v26  ;;  %v2033_v52 = vrot.slane %v1011_v42, 7  ;;  %v4026_v53 = vsel %vm1783_vm0, %v1760_v10, %v1761_v38 }
 0x156   : > { %v865_v59 = vpop.f32.mrf.mxu0  ;;  %v1015_v60 = vpop.f32.mrf.mxu1  ;;  %1476 = vmatmul.mubr.bf16.gmra.mxu1 %v3824_v16  ;;  %3198 = vmatmul.mubr.bf16.gmra.mxu0 %v3772_v43 }
 0x157   : > { %v1762_v63 = vrot.slane %v865_v59, 7  ;;  %v1910_v7 = vrot.slane %v1015_v60, 1  ;;  %1485 = vmatprep.mubr.bf16.mxu1 %v5463_v0  ;;  %3201 = vmatprep.mubr.bf16.mxu0 %v3785_v54  ;;  %v4036_v8 = vsel %vm1783_vm0, %v5461_v36, %v2033_v52 }
 0x158   : > { %v4038_v10 = vpop.f32.mrf.mxu0  ;;  %v1017_v22 = vpop.f32.mrf.mxu1 }
 0x159   : > { %v4042_v23 = vsel %vm1939_vm1, %v1909_v26, %v1910_v7  ;;  %v2034_v43 = vrot.slane %v1017_v22, 7  ;;  %v4046_v24 = vsel %vm1783_vm0, %v1761_v38, %v1762_v63 }
 0x15a   : > { %v869_v42 = vpop.f32.mrf.mxu0  ;;  %v1019_v54 = vpop.f32.mrf.mxu1 }
 0x15b   : > { %v4050_v59 = vsel %vm1783_vm0, %v2033_v52, %v2034_v43  ;;  %v1763_v60 = vrot.slane %v869_v42, 7  ;;  %v1911_v36 = vrot.slane %v1019_v54, 1 }
 0x15c   : > { %v4052_v41 = vpop.f32.mrf.mxu0  ;;  %v1021_v0 = vpop.f32.mrf.mxu1 }
 0x15d   : > { %5512 = vst [vmem:[#allocation23_spill] sm:$0xff] %v4052_v41  ;;  %v4056_v26 = vsel %vm1939_vm1, %v1910_v7, %v1911_v36  ;;  %v2035_v22 = vrot.slane %v1021_v0, 7  ;;  %v4060_v38 = vsel %vm1783_vm0, %v1762_v63, %v1763_v60 }
 0x15e   : > { %5513 = vst [vmem:[#allocation24_spill] sm:$0xff] %v4060_v38  ;;  %v875_v28 = vpop.f32.mrf.mxu0  ;;  %v1025_v30 = vpop.f32.mrf.mxu1  ;;  %1486 = vmatmul.mubr.bf16.gmra.mxu1 %v3831_v19  ;;  %3202 = vmatmul.mubr.bf16.gmra.mxu0 %v3792_v61  ;;  %v4287_v38 = vadd.s32 8, %v3899_v33 }
 0x15f   : > { %v4066_v52 = vsel %vm1783_vm0, %v2034_v43, %v2035_v22  ;;  %v1764_v42 = vrot.slane %v875_v28, 7  ;;  %v1912_v54 = vrot.slane %v1025_v30, 1  ;;  %1495 = vmatprep.mubr.bf16.mxu1 %v5514_v12  ;;  %3205 = vmatprep.mubr.bf16.mxu0 %v3803_v4 }
 0x160   : > { %v4070_v0 = vpop.f32.mrf.mxu0  ;;  %v1027_v63 = vpop.f32.mrf.mxu1  ;;  %vm1712_vm3 = vcmp.le.s32.totalorder %v4287_v38, 14 }
 0x161   : > { %5515 = vst [vmem:[#allocation25_spill] sm:$0xff] %v4070_v0  ;;  %v4074_v7 = vsel %vm1939_vm1, %v1911_v36, %v1912_v54  ;;  %v2036_v2 = vrot.slane %v1027_v63, 7  ;;  %v4078_v61 = vsel %vm1783_vm0, %v1763_v60, %v1764_v42 }
 0x162   : > { %5516 = vst [vmem:[#allocation26_spill] sm:$0xff] %v4078_v61  ;;  %v879_v43 = vpop.f32.mrf.mxu0  ;;  %v1029_v5 = vpop.f32.mrf.mxu1 }
 0x163   : > { %v4082_v28 = vsel %vm1783_vm0, %v2035_v22, %v2036_v2  ;;  %v1765_v30 = vrot.slane %v879_v43, 7  ;;  %v1913_v4 = vrot.slane %v1029_v5, 1 }
 0x164   : > { %v4084_v56 = vpop.f32.mrf.mxu0  ;;  %v1031_v47 = vpop.f32.mrf.mxu1 }
 0x165   : > { %5517 = vst [vmem:[#allocation27_spill] sm:$0xff] %v4084_v56  ;;  %v4088_v36 = vsel %vm1939_vm1, %v1912_v54, %v1913_v4  ;;  %v2037_v63 = vrot.slane %v1031_v47, 7  ;;  %v4092_v60 = vsel %vm1783_vm0, %v1764_v42, %v1765_v30 }
 0x166   : > { %5518 = vst [vmem:[#allocation28_spill] sm:$0xff] %v4092_v60  ;;  %v885_v49 = vpop.f32.mrf.mxu0  ;;  %v1035_v35 = vpop.f32.mrf.mxu1  ;;  %1496 = vmatmul.mubr.bf16.gmra.mxu1 %v3838_v20  ;;  %3206 = vmatmul.mubr.bf16.gmra.mxu0 %v3810_v9 }
 0x167   : > { %v4098_v5 = vsel %vm1783_vm0, %v2036_v2, %v2037_v63  ;;  %v1766_v22 = vrot.slane %v885_v49, 7  ;;  %v1914_v43 = vrot.slane %v1035_v35, 1  ;;  %1505 = vmatprep.mubr.bf16.mxu1 %v5514_v12  ;;  %3209 = vmatprep.mubr.bf16.mxu0 %v3817_v14 }
 0x168   : > { %v4102_v47 = vpop.f32.mrf.mxu0  ;;  %v1037_v42 = vpop.f32.mrf.mxu1 }
 0x169   : > { %5519 = vst [vmem:[#allocation29_spill] sm:$0xff] %v4102_v47  ;;  %v4106_v54 = vsel %vm1939_vm1, %v1913_v4, %v1914_v43  ;;  %v2038_v15 = vrot.slane %v1037_v42, 7  ;;  %v4110_v9 = vsel %vm1783_vm0, %v1765_v30, %v1766_v22 }
 0x16a   : > { %5520 = vst [vmem:[#allocation30_spill] sm:$0xff] %v4110_v9  ;;  %v889_v2 = vpop.f32.mrf.mxu0  ;;  %v1039_v58 = vpop.f32.mrf.mxu1 }
 0x16b   : > { %v4114_v35 = vsel %vm1783_vm0, %v2037_v63, %v2038_v15  ;;  %v1767_v49 = vrot.slane %v889_v2, 7  ;;  %v1915_v14 = vrot.slane %v1039_v58, 1 }
 0x16c   : > { %v4116_v21 = vpop.f32.mrf.mxu0  ;;  %v1041_v47 = vpop.f32.mrf.mxu1 }
 0x16d   : > { %5521 = vst [vmem:[#allocation31_spill] sm:$0xff] %v4116_v21  ;;  %v4120_v4 = vsel %vm1939_vm1, %v1914_v43, %v1915_v14  ;;  %v2039_v42 = vrot.slane %v1041_v47, 7  ;;  %v4124_v30 = vsel %vm1783_vm0, %v1766_v22, %v1767_v49 }
 0x16e   : > { %5522 = vst [vmem:[#allocation32_spill] sm:$0xff] %v4124_v30  ;;  %v895_v9 = vpop.f32.mrf.mxu0  ;;  %v1045_v56 = vpop.f32.mrf.mxu1  ;;  %1506 = vmatmul.mubr.bf16.gmra.mxu1 %v3749_v18  ;;  %3210 = vmatmul.mubr.bf16.gmra.mxu0 %v3824_v16 }
 0x16f   : > { %v4130_v58 = vsel %vm1783_vm0, %v2038_v15, %v2039_v42  ;;  %v1768_v63 = vrot.slane %v895_v9, 7  ;;  %v1916_v2 = vrot.slane %v1045_v56, 1  ;;  %1515 = vmatprep.mubr.bf16.mxu1 %v5514_v12  ;;  %3213 = vmatprep.mubr.bf16.mxu0 %v3831_v19 }
 0x170   : > { %v4134_v43 = vpop.f32.mrf.mxu0  ;;  %v1047_v22 = vpop.f32.mrf.mxu1 }
 0x171   : > { %5523 = vst [vmem:[#allocation33_spill] sm:$0xff] %v4134_v43  ;;  %v4138_v47 = vsel %vm1939_vm1, %v1915_v14, %v1916_v2  ;;  %v2040_v21 = vrot.slane %v1047_v22, 7  ;;  %v4142_v16 = vsel %vm1783_vm0, %v1767_v49, %v1768_v63 }
 0x172   : > { %5524 = vst [vmem:[#allocation34_spill] sm:$0xff] %v4142_v16  ;;  %v899_v15 = vpop.f32.mrf.mxu0  ;;  %v1049_v30 = vpop.f32.mrf.mxu1 }
 0x173   : > { %v4146_v56 = vsel %vm1783_vm0, %v2039_v42, %v2040_v21  ;;  %v1769_v9 = vrot.slane %v899_v15, 7  ;;  %v1917_v19 = vrot.slane %v1049_v30, 1 }
 0x174   : > { %v4148_v60 = vpop.f32.mrf.mxu0  ;;  %v1051_v43 = vpop.f32.mrf.mxu1 }
 0x175   : > { %5525 = vst [vmem:[#allocation35_spill] sm:$0xff] %v4148_v60  ;;  %v4152_v14 = vsel %vm1939_vm1, %v1916_v2, %v1917_v19  ;;  %v2041_v22 = vrot.slane %v1051_v43, 7  ;;  %v4156_v49 = vsel %vm1783_vm0, %v1768_v63, %v1769_v9 }
 0x176   : > { %5526 = vst [vmem:[#allocation36_spill] sm:$0xff] %v4156_v49  ;;  %v905_v16 = vpop.f32.mrf.mxu0  ;;  %v1055_v0 = vpop.f32.mrf.mxu1  ;;  %1516 = vmatmul.mubr.bf16.gmra.mxu1 %v3757_v27  ;;  %3214 = vmatmul.mubr.bf16.gmra.mxu0 %v3838_v20 }
 0x177   : > { %v4162_v42 = vsel %vm1783_vm0, %v2040_v21, %v2041_v22  ;;  %v1770_v30 = vrot.slane %v905_v16, 7  ;;  %v1918_v15 = vrot.slane %v1055_v0, 1  ;;  %1525 = vmatprep.mubr.bf16.mxu1 %v5514_v12  ;;  %3217 = vmatprep.mubr.bf16.mxu0 %v3749_v18 }
 0x178   : > { %v4166_v2 = vpop.f32.mrf.mxu0  ;;  %v1057_v63 = vpop.f32.mrf.mxu1 }
 0x179   : > { %5527 = vst [vmem:[#allocation37_spill] sm:$0xff] %v4166_v2  ;;  %v4170_v43 = vsel %vm1939_vm1, %v1917_v19, %v1918_v15  ;;  %v2042_v60 = vrot.slane %v1057_v63, 7  ;;  %v4174_v20 = vsel %vm1783_vm0, %v1769_v9, %v1770_v30 }
 0x17a   : > { %5528 = vst [vmem:[#allocation38_spill] sm:$0xff] %v4174_v20  ;;  %v909_v21 = vpop.f32.mrf.mxu0  ;;  %v1059_v49 = vpop.f32.mrf.mxu1 }
 0x17b   : > { %v4178_v0 = vsel %vm1783_vm0, %v2041_v22, %v2042_v60  ;;  %v1771_v16 = vrot.slane %v909_v21, 7  ;;  %v1919_v18 = vrot.slane %v1059_v49, 1 }
 0x17c   : > { %v4180_v61 = vpop.f32.mrf.mxu0  ;;  %v1061_v2 = vpop.f32.mrf.mxu1 }
 0x17d   : > { %5529 = vst [vmem:[#allocation39_spill] sm:$0xff] %v4180_v61  ;;  %v4184_v19 = vsel %vm1939_vm1, %v1918_v15, %v1919_v18  ;;  %v2043_v63 = vrot.slane %v1061_v2, 7  ;;  %v4188_v9 = vsel %vm1783_vm0, %v1770_v30, %v1771_v16 }
 0x17e   : > { %5530 = vst [vmem:[#allocation40_spill] sm:$0xff] %v4188_v9  ;;  %v915_v20 = vpop.f32.mrf.mxu0  ;;  %v1065_v41 = vpop.f32.mrf.mxu1  ;;  %1526 = vmatmul.mubr.bf16.gmra.mxu1 %v3768_v37  ;;  %3218 = vmatmul.mubr.bf16.gmra.mxu0 %v3757_v27 }
 0x17f   : > { %v4194_v22 = vsel %vm1783_vm0, %v2042_v60, %v2043_v63  ;;  %v1772_v49 = vrot.slane %v915_v20, 7  ;;  %v1920_v21 = vrot.slane %v1065_v41, 1  ;;  %1535 = vmatprep.mubr.bf16.mxu1 %v5514_v12  ;;  %3221 = vmatprep.mubr.bf16.mxu0 %v3768_v37 }
 0x180   : > { %v4198_v15 = vpop.f32.mrf.mxu0  ;;  %v1067_v30 = vpop.f32.mrf.mxu1 }
 0x181   : > { %5531 = vst [vmem:[#allocation41_spill] sm:$0xff] %v4198_v15  ;;  %v4202_v2 = vsel %vm1939_vm1, %v1919_v18, %v1920_v21  ;;  %v2044_v61 = vrot.slane %v1067_v30, 7  ;;  %v4206_v27 = vsel %vm1783_vm0, %v1771_v16, %v1772_v49 }
 0x182   : > { %5532 = vst [vmem:[#allocation42_spill] sm:$0xff] %v4202_v2  ;;  %5533 = vst [vmem:[#allocation43_spill] sm:$0xff] %v4206_v27  ;;  %v919_v60 = vpop.f32.mrf.mxu0  ;;  %v1069_v9 = vpop.f32.mrf.mxu1 }
 0x183   : > { %v4210_v41 = vsel %vm1783_vm0, %v2043_v63, %v2044_v61  ;;  %v1773_v12 = vrot.slane %v919_v60, 7  ;;  %v1921_v37 = vrot.slane %v1069_v9, 1 }
 0x184   : > { %5534 = vst [vmem:[#allocation44_spill] sm:$0xff] %v4210_v41  ;;  %v4212_v20 = vpop.f32.mrf.mxu0  ;;  %v1071_v15 = vpop.f32.mrf.mxu1 }
 0x185   : > { %5535 = vst [vmem:[#allocation45_spill] sm:$0xff] %v4212_v20  ;;  %v4216_v18 = vsel %vm1939_vm1, %v1920_v21, %v1921_v37  ;;  %v2045_v30 = vrot.slane %v1071_v15, 7  ;;  %v4220_v16 = vsel %vm1783_vm0, %v1772_v49, %v1773_v12 }
 0x186   : > { %5536 = vst [vmem:[#allocation46_spill] sm:$0xff] %v4216_v18  ;;  %5537 = vst [vmem:[#allocation47_spill] sm:$0xff] %v4220_v16  ;;  %v925_v27 = vpop.f32.mrf.mxu0  ;;  %v1075_v2 = vpop.f32.mrf.mxu1  ;;  %1536 = vmatmul.mubr.bf16.gmra.mxu1 %v3775_v44  ;;  %3222 = vmatmul.mubr.bf16.gmra.mxu0 %v3775_v44 }
 0x187   : > { %v4226_v63 = vsel %vm1783_vm0, %v2044_v61, %v2045_v30  ;;  %v1774_v9 = vrot.slane %v925_v27, 7  ;;  %v1922_v60 = vrot.slane %v1075_v2, 1 }
 0x188   : > { %5538 = vst [vmem:[#allocation48_spill] sm:$0xff] %v4226_v63  ;;  %v4228_v20 = vpop.f32.mrf.mxu0  ;;  %v1077_v21 = vpop.f32.mrf.mxu1 }
 0x189   : > { %5539 = vst [vmem:[#allocation49_spill] sm:$0xff] %v4228_v20  ;;  %v4232_v15 = vsel %vm1939_vm1, %v1921_v37, %v1922_v60  ;;  %v2046_v49 = vrot.slane %v1077_v21, 7  ;;  %v4236_v16 = vsel %vm1783_vm0, %v1773_v12, %v1774_v9 }
 0x18a   : > { %5540 = vst [vmem:[#allocation50_spill] sm:$0xff] %v4232_v15  ;;  %5541 = vst [vmem:[#allocation51_spill] sm:$0xff] %v4236_v16  ;;  %v929_v18 = vpop.f32.mrf.mxu0  ;;  %v1079_v44 = vpop.f32.mrf.mxu1  ;;  %v5546_v16 = vrot.slane %v3895_v32, 7 }
 0x18b   : > { %v4240_v61 = vsel %vm1783_vm0, %v2045_v30, %v2046_v49  ;;  %v1775_v27 = vrot.slane %v929_v18, 7  ;;  %v1923_v2 = vrot.slane %v1079_v44, 1 }
 0x18c   : > { %5542 = vst [vmem:[#allocation52_spill] sm:$0xff] %v4240_v61  ;;  %v4242_v63 = vpop.f32.mrf.mxu0  ;;  %v1081_v20 = vpop.f32.mrf.mxu1 }
 0x18d   : > { %5543 = vst [vmem:[#allocation53_spill] sm:$0xff] %v4242_v63  ;;  %v4246_v37 = vsel %vm1939_vm1, %v1922_v60, %v1923_v2  ;;  %v2047_v21 = vrot.slane %v1081_v20, 7  ;;  %v4250_v12 = vsel %vm1783_vm0, %v1774_v9, %v1775_v27  ;;  %v4256_v30 = vsel %vm1783_vm0, %v1775_v27, %v5546_v16  ;;  %v4273_v16 = vld [vmem:[%s5455_s2] ss:$0 sm:$0xff] }
 0x18e   : > { %5544 = vst [vmem:[#allocation54_spill] sm:$0xff] %v4246_v37  ;;  %5545 = vst [vmem:[#allocation55_spill] sm:$0xff] %v4250_v12  ;;  %v1085_v18 = vpop.f32.mrf.mxu1  ;;  %v4258_v44 = vpop.f32.mrf.mxu0 }
 0x18f   : > { %5547 = vst [vmem:[#allocation56_spill] sm:$0xff] %v4256_v30  ;;  %5548 = vst [vmem:[#allocation57_spill] sm:$0xff] %v4258_v44  ;;  %v4262_v63 = vsel %vm1783_vm0, %v2046_v49, %v2047_v21  ;;  %v1924_v60 = vrot.slane %v1085_v18, 1 }
 0x190   : > { %5549 = vst [vmem:[#allocation58_spill] sm:$0xff] %v4262_v63  ;;  %v1087_v37 = vpop.f32.mrf.mxu1  ;;  %v4264_v20 = vpop.f32.mrf.mxu0 }
 0x191   : > { %5550 = vst [vmem:[#allocation59_spill] sm:$0xff] %v4264_v20  ;;  %v4268_v9 = vsel %vm1939_vm1, %v1923_v2, %v1924_v60  ;;  %v2048_v32 = vrot.slane %v1087_v37, 7  ;;  %v5467_v63 = vrot.slane %v4264_v20, 1 }
 0x192   : > { %5551 = vst [vmem:[#allocation60_spill] sm:$0xff] %v4268_v9  ;;  %v1089_v27 = vpop.f32.mrf.mxu1  ;;  %v1201_v12 = vpop.f32.mrf.mxu0 }
 0x193   : > { %v4277_v49 = vsel %vm1783_vm0, %v2047_v21, %v2048_v32  ;;  %v1925_v18 = vrot.slane %v1089_v27, 1  ;;  %v1721_v30 = vadd.f32 %v4273_v16, %v1201_v12 }
 0x194   : > { %5552 = vst [vmem:[#allocation61_spill] sm:$0xff] %v4277_v49  ;;  %v1091_v15 = vpop.f32.mrf.mxu1  ;;  %v1203_v2 = vpop.f32.mrf.mxu0 }
 0x195   : > { %v4283_v37 = vsel %vm1939_vm1, %v1924_v60, %v1925_v18  ;;  %v2129_v9 = vadd.f32 %v4036_v8, %v1721_v30  ;;  %v2049_v44 = vrot.slane %v1091_v15, 7  ;;  %v2161_v61 = vrot.slane %v1203_v2, 1 }
 0x196   : > { %5553 = vst [vmem:[#allocation62_spill] sm:$0xff] %v4283_v37  ;;  %v1095_v21 = vpop.f32.mrf.mxu1  ;;  %v1207_v27 = vpop.f32.mrf.mxu0  ;;  %v1814_v30 = vsel %vm1709_vm2, %v3998_v6, 0.0 }
 0x197   : > { %v4292_v12 = vsel %vm1783_vm0, %v2048_v32, %v2049_v44  ;;  %v4298_v60 = vsel %vm1939_vm1, %v5467_v63, %v2161_v61  ;;  %v1926_v8 = vrot.slane %v1095_v21, 1  ;;  %v1722_v15 = vadd.f32 %v4273_v16, %v1207_v27 }
 0x198   : > { %5554 = vst [vmem:[#allocation63_spill] sm:$0xff] %v4292_v12  ;;  %5555 = vst [vmem:[#allocation64_spill] sm:$0xff] %v4298_v60  ;;  %v1097_v2 = vpop.f32.mrf.mxu1  ;;  %v1209_v37 = vpop.f32.mrf.mxu0 }
 0x199   : > { %v4306_v49 = vsel %vm1939_vm1, %v1925_v18, %v1926_v8  ;;  %v1846_v32 = vadd.f32 %v1814_v30, %v1722_v15  ;;  %v2050_v12 = vrot.slane %v1097_v2, 7  ;;  %v2162_v20 = vrot.slane %v1209_v37, 1 }
 0x19a   : > { %5556 = vst [vmem:[#allocation65_spill] sm:$0xff] %v4306_v49  ;;  %v1099_v63 = vpop.f32.mrf.mxu1  ;;  %v1211_v60 = vpop.f32.mrf.mxu0 }
 0x19b   : > { %v1878_v21 = vadd.f32 %v1846_v32, %v3903_v34  ;;  %v4312_v27 = vsel %vm1783_vm0, %v2049_v44, %v2050_v12  ;;  %v2221_v6 = vsel %vm1939_vm1, %v2161_v61, %v2162_v20  ;;  %v1927_v41 = vrot.slane %v1099_v63, 1 }
 0x19c   : > { %5557 = vst [vmem:[#allocation66_spill] sm:$0xff] %v4312_v27  ;;  %v1723_v18 = vadd.f32 %v4273_v16, %v1211_v60  ;;  %v1101_v49 = vpop.f32.mrf.mxu1  ;;  %v1213_v15 = vpop.f32.mrf.mxu0  ;;  %v2225_v37 = vsel %vm1712_vm3, %v2221_v6, 0.0  ;;  %v2098_v61 = vsel %vm1709_vm2, %v4050_v59, 0.0  ;;  %v1971_v59 = vsel %vm1712_vm3, %v4042_v23, 0.0 }
 0x19d   : > { %v2002_v30 = vadd.f32 %v4022_v50, %v1878_v21  ;;  %v4322_v34 = vsel %vm1939_vm1, %v1926_v8, %v1927_v41  ;;  %v2051_v2 = vrot.slane %v1101_v49, 7  ;;  %v2163_v44 = vrot.slane %v1213_v15, 1 }
 0x19e   : > { %5558 = vst [vmem:[#allocation67_spill] sm:$0xff] %v4322_v34  ;;  %v1847_v63 = vadd.f32 %v3918_v48, %v1723_v18  ;;  %v1105_v60 = vpop.f32.mrf.mxu1  ;;  %v1217_v32 = vpop.f32.mrf.mxu0  ;;  %v4328_v27 = vadd.f32 %v2225_v37, %v2129_v9  ;;  %v1816_v9 = vsel %vm1709_vm2, %v3936_v57, 0.0 }
 0x19f   : > { %v4332_v6 = vsel %vm1783_vm0, %v2050_v12, %v2051_v2  ;;  %v2220_v50 = vsel %vm1939_vm1, %v2162_v20, %v2163_v44  ;;  %v1928_v8 = vrot.slane %v1105_v60, 1  ;;  %v1724_v49 = vadd.f32 %v4273_v16, %v1217_v32 }
 0x1a0   : > { %5559 = vst [vmem:[#allocation68_spill] sm:$0xff] %v4328_v27  ;;  %v1879_v48 = vadd.f32 %v1847_v63, %v3910_v46  ;;  %v1107_v21 = vpop.f32.mrf.mxu1  ;;  %v1219_v18 = vpop.f32.mrf.mxu0  ;;  %v2130_v12 = vadd.f32 %v2098_v61, %v2002_v30 }
 0x1a1   : > { %v4346_v15 = vsel %vm1939_vm1, %v1927_v41, %v1928_v8  ;;  %v1848_v20 = vadd.f32 %v1816_v9, %v1724_v49  ;;  %v2052_v37 = vrot.slane %v1107_v21, 7  ;;  %v2164_v60 = vrot.slane %v1219_v18, 1 }
 0x1a2   : > { %v2003_v32 = vadd.f32 %v1971_v59, %v1879_v48  ;;  %v1109_v27 = vpop.f32.mrf.mxu1  ;;  %v1221_v34 = vpop.f32.mrf.mxu0  ;;  %v4348_v23 = vadd.f32 %v2220_v50, %v2130_v12 }
 0x1a3   : > { %v1880_v46 = vadd.f32 %v1848_v20, %v3930_v55  ;;  %v4353_v57 = vsel %vm1783_vm0, %v2051_v2, %v2052_v37  ;;  %v2219_v30 = vsel %vm1939_vm1, %v2163_v44, %v2164_v60  ;;  %v1929_v61 = vrot.slane %v1109_v27, 1 }
 0x1a4   : > { %v1725_v41 = vadd.f32 %v4273_v16, %v1221_v34  ;;  %v1111_v63 = vpop.f32.mrf.mxu1  ;;  %v1223_v49 = vpop.f32.mrf.mxu0  ;;  %v2131_v59 = vadd.f32 %v4066_v52, %v2003_v32  ;;  %v2227_v50 = vsel %vm1712_vm3, %v2219_v30, 0.0  ;;  %v2100_v27 = vsel %vm1709_vm2, %v4082_v28, 0.0 }
 0x1a5   : > { %v2004_v48 = vadd.f32 %v4056_v26, %v1880_v46  ;;  %v4364_v55 = vsel %vm1939_vm1, %v1928_v8, %v1929_v61  ;;  %v2053_v2 = vrot.slane %v1111_v63, 7  ;;  %v2165_v9 = vrot.slane %v1223_v49, 1 }
 0x1a6   : > { %v1849_v34 = vadd.f32 %v3948_v3, %v1725_v41  ;;  %v1115_v44 = vpop.f32.mrf.mxu1  ;;  %v1227_v21 = vpop.f32.mrf.mxu0  ;;  %v4370_v52 = vadd.f32 %v2227_v50, %v2131_v59  ;;  %v1973_v28 = vsel %vm1712_vm3, %v4074_v7, 0.0  ;;  %v1818_v20 = vsel %vm1709_vm2, %v3964_v13, 0.0 }
 0x1a7   : > { %v4374_v18 = vsel %vm1783_vm0, %v2052_v37, %v2053_v2  ;;  %v2218_v26 = vsel %vm1939_vm1, %v2164_v60, %v2165_v9  ;;  %v1930_v8 = vrot.slane %v1115_v44, 1  ;;  %v1726_v12 = vadd.f32 %v4273_v16, %v1227_v21 }
 0x1a8   : > { %v1881_v3 = vadd.f32 %v1849_v34, %v3942_v1  ;;  %v1117_v32 = vpop.f32.mrf.mxu1  ;;  %v1229_v46 = vpop.f32.mrf.mxu0  ;;  %v2132_v37 = vadd.f32 %v2100_v27, %v2004_v48 }
 0x1a9   : > { %v4388_v30 = vsel %vm1939_vm1, %v1929_v61, %v1930_v8  ;;  %v1850_v60 = vadd.f32 %v1818_v20, %v1726_v12  ;;  %v2054_v41 = vrot.slane %v1117_v32, 7  ;;  %v2166_v63 = vrot.slane %v1229_v46, 1 }
 0x1aa   : > { %v2005_v49 = vadd.f32 %v1973_v28, %v1881_v3  ;;  %v1119_v59 = vpop.f32.mrf.mxu1  ;;  %v1231_v50 = vpop.f32.mrf.mxu0  ;;  %v4390_v7 = vadd.f32 %v2218_v26, %v2132_v37 }
 0x1ab   : > { %v1882_v1 = vadd.f32 %v1850_v60, %v3958_v11  ;;  %v4395_v13 = vsel %vm1783_vm0, %v2053_v2, %v2054_v41  ;;  %v2217_v48 = vsel %vm1939_vm1, %v2165_v9, %v2166_v63  ;;  %v1931_v27 = vrot.slane %v1119_v59, 1 }
 0x1ac   : > { %v1727_v61 = vadd.f32 %v4273_v16, %v1231_v50  ;;  %v1121_v34 = vpop.f32.mrf.mxu1  ;;  %v1233_v44 = vpop.f32.mrf.mxu0  ;;  %v2133_v21 = vadd.f32 %v4098_v5, %v2005_v49  ;;  %v2229_v26 = vsel %vm1712_vm3, %v2217_v48, 0.0  ;;  %v2102_v9 = vsel %vm1709_vm2, %v4114_v35, 0.0 }
 0x1ad   : > { %v2006_v12 = vadd.f32 %v4088_v36, %v1882_v1  ;;  %v4406_v11 = vsel %vm1939_vm1, %v1930_v8, %v1931_v27  ;;  %v2055_v2 = vrot.slane %v1121_v34, 7  ;;  %v2167_v28 = vrot.slane %v1233_v44, 1 }
 0x1ae   : > { %v1851_v3 = vadd.f32 %v3976_v29, %v1727_v61  ;;  %v1125_v20 = vpop.f32.mrf.mxu1  ;;  %v1237_v32 = vpop.f32.mrf.mxu0  ;;  %v4412_v5 = vadd.f32 %v2229_v26, %v2133_v21  ;;  %v1975_v35 = vsel %vm1712_vm3, %v4106_v54, 0.0  ;;  %v1820_v60 = vsel %vm1709_vm2, %v3990_v51, 0.0 }
 0x1af   : > { %v4416_v46 = vsel %vm1783_vm0, %v2054_v41, %v2055_v2  ;;  %v2216_v36 = vsel %vm1939_vm1, %v2166_v63, %v2167_v28  ;;  %v1932_v8 = vrot.slane %v1125_v20, 1  ;;  %v1728_v37 = vadd.f32 %v4273_v16, %v1237_v32 }
 0x1b0   : > { %v1883_v29 = vadd.f32 %v1851_v3, %v3970_v25  ;;  %v1127_v49 = vpop.f32.mrf.mxu1  ;;  %v1239_v59 = vpop.f32.mrf.mxu0  ;;  %v2134_v41 = vadd.f32 %v2102_v9, %v2006_v12 }
 0x1b1   : > { %v4430_v50 = vsel %vm1939_vm1, %v1931_v27, %v1932_v8  ;;  %v1852_v63 = vadd.f32 %v1820_v60, %v1728_v37  ;;  %v2056_v1 = vrot.slane %v1127_v49, 7  ;;  %v2168_v48 = vrot.slane %v1239_v59, 1 }
 0x1b2   : > { %v2007_v61 = vadd.f32 %v1975_v35, %v1883_v29  ;;  %v1129_v34 = vpop.f32.mrf.mxu1  ;;  %v1241_v44 = vpop.f32.mrf.mxu0  ;;  %v4432_v54 = vadd.f32 %v2216_v36, %v2134_v41  ;;  %v1822_v59 = vsel %vm1709_vm2, %v4014_v40, 0.0 }
 0x1b3   : > { %v1884_v25 = vadd.f32 %v1852_v63, %v3986_v45  ;;  %v4437_v51 = vsel %vm1783_vm0, %v2055_v2, %v2056_v1  ;;  %v2215_v21 = vsel %vm1939_vm1, %v2167_v28, %v2168_v48  ;;  %v1933_v26 = vrot.slane %v1129_v34, 1 }
 0x1b4   : > { %v1729_v27 = vadd.f32 %v4273_v16, %v1241_v44  ;;  %v1131_v12 = vpop.f32.mrf.mxu1  ;;  %v1243_v9 = vpop.f32.mrf.mxu0  ;;  %v2135_v3 = vadd.f32 %v4130_v58, %v2007_v61  ;;  %v2231_v20 = vsel %vm1712_vm3, %v2215_v21, 0.0  ;;  %v2104_v28 = vsel %vm1709_vm2, %v4146_v56, 0.0 }
 0x1b5   : > { %v2008_v32 = vadd.f32 %v4120_v4, %v1884_v25  ;;  %v4448_v45 = vsel %vm1939_vm1, %v1932_v8, %v1933_v26  ;;  %v2057_v2 = vrot.slane %v1131_v12, 7  ;;  %v2169_v36 = vrot.slane %v1243_v9, 1 }
 0x1b6   : > { %v1853_v37 = vadd.f32 %v4002_v17, %v1729_v27  ;;  %v1135_v35 = vpop.f32.mrf.mxu1  ;;  %v1247_v29 = vpop.f32.mrf.mxu0  ;;  %v4454_v58 = vadd.f32 %v2231_v20, %v2135_v3  ;;  %v1977_v56 = vsel %vm1712_vm3, %v4138_v47, 0.0 }
 0x1b7   : > { %v4458_v60 = vsel %vm1783_vm0, %v2056_v1, %v2057_v2  ;;  %v2214_v4 = vsel %vm1939_vm1, %v2168_v48, %v2169_v36  ;;  %v1934_v8 = vrot.slane %v1135_v35, 1  ;;  %v1730_v49 = vadd.f32 %v4273_v16, %v1247_v29 }
 0x1b8   : > { %v1885_v17 = vadd.f32 %v1853_v37, %v3992_v62  ;;  %v1137_v41 = vpop.f32.mrf.mxu1  ;;  %v1249_v63 = vpop.f32.mrf.mxu0  ;;  %v2136_v1 = vadd.f32 %v2104_v28, %v2008_v32 }
 0x1b9   : > { %v4472_v61 = vsel %vm1939_vm1, %v1933_v26, %v1934_v8  ;;  %v1854_v48 = vadd.f32 %v1822_v59, %v1730_v49  ;;  %v2058_v34 = vrot.slane %v1137_v41, 7  ;;  %v2170_v44 = vrot.slane %v1249_v63, 1 }
 0x1ba   : > { %v2009_v25 = vadd.f32 %v1977_v56, %v1885_v17  ;;  %v1139_v21 = vpop.f32.mrf.mxu1  ;;  %v1251_v27 = vpop.f32.mrf.mxu0  ;;  %v4474_v47 = vadd.f32 %v2214_v4, %v2136_v1  ;;  %v1824_v59 = vsel %vm1709_vm2, %v4046_v24, 0.0 }
 0x1bb   : > { %v1886_v62 = vadd.f32 %v1854_v48, %v4008_v31  ;;  %v4479_v40 = vsel %vm1783_vm0, %v2057_v2, %v2058_v34  ;;  %v2213_v12 = vsel %vm1939_vm1, %v2169_v36, %v2170_v44  ;;  %v1935_v9 = vrot.slane %v1139_v21, 1 }
 0x1bc   : > { %v1731_v26 = vadd.f32 %v4273_v16, %v1251_v27  ;;  %v1141_v3 = vpop.f32.mrf.mxu1  ;;  %v1253_v20 = vpop.f32.mrf.mxu0  ;;  %v2137_v32 = vadd.f32 %v4162_v42, %v2009_v25  ;;  %v2233_v28 = vsel %vm1712_vm3, %v2213_v12, 0.0  ;;  %v2106_v36 = vsel %vm1709_vm2, %v4178_v0, 0.0 }
 0x1bd   : > { %v2010_v37 = vadd.f32 %v4152_v14, %v1886_v62  ;;  %v4490_v31 = vsel %vm1939_vm1, %v1934_v8, %v1935_v9  ;;  %v2059_v2 = vrot.slane %v1141_v3, 7  ;;  %v2171_v35 = vrot.slane %v1253_v20, 1 }
 0x1be   : > { %v1855_v29 = vadd.f32 %v4026_v53, %v1731_v26  ;;  %v1145_v4 = vpop.f32.mrf.mxu1  ;;  %v1257_v49 = vpop.f32.mrf.mxu0  ;;  %v4496_v42 = vadd.f32 %v2233_v28, %v2137_v32  ;;  %v1979_v0 = vsel %vm1712_vm3, %v4170_v43, 0.0 }
 0x1bf   : > { %v4500_v56 = vsel %vm1783_vm0, %v2058_v34, %v2059_v2  ;;  %v2212_v14 = vsel %vm1939_vm1, %v2170_v44, %v2171_v35  ;;  %v1936_v8 = vrot.slane %v1145_v4, 1  ;;  %v1732_v17 = vadd.f32 %v4273_v16, %v1257_v49  ;;  %v5561_v4 = vld [vmem:[#allocation24_spill] sm:$0xff] }
 0x1c0   : > { %v1887_v53 = vadd.f32 %v1855_v29, %v4017_v39  ;;  %v1147_v41 = vpop.f32.mrf.mxu1  ;;  %v1259_v63 = vpop.f32.mrf.mxu0  ;;  %v2138_v1 = vadd.f32 %v2106_v36, %v2010_v37  ;;  %v5560_v29 = vld [vmem:[#allocation44_spill] sm:$0xff] }
 0x1c1   : > { %v4514_v48 = vsel %vm1939_vm1, %v1935_v9, %v1936_v8  ;;  %v1856_v34 = vadd.f32 %v1824_v59, %v1732_v17  ;;  %v2060_v44 = vrot.slane %v1147_v41, 7  ;;  %v2172_v25 = vrot.slane %v1259_v63, 1  ;;  %v5563_v59 = vld [vmem:[#allocation42_spill] sm:$0xff]  ;;  %v5564_v63 = vld [vmem:[#allocation23_spill] sm:$0xff] }
 0x1c2   : > { %v2011_v21 = vadd.f32 %v1979_v0, %v1887_v53  ;;  %v1149_v27 = vpop.f32.mrf.mxu1  ;;  %v1261_v62 = vpop.f32.mrf.mxu0  ;;  %v4516_v43 = vadd.f32 %v2212_v14, %v2138_v1  ;;  %v1981_v41 = vsel %vm1712_vm3, %v5563_v59, 0.0 }
 0x1c3   : > { %v1888_v39 = vadd.f32 %v1856_v34, %v4038_v10  ;;  %v4521_v24 = vsel %vm1783_vm0, %v2059_v2, %v2060_v44  ;;  %v2211_v12 = vsel %vm1939_vm1, %v2171_v35, %v2172_v25  ;;  %v1937_v26 = vrot.slane %v1149_v27, 1  ;;  %v5565_v34 = vld [vmem:[#allocation26_spill] sm:$0xff] }
 0x1c4   : > { %v1733_v9 = vadd.f32 %v4273_v16, %v1261_v62  ;;  %v1151_v3 = vpop.f32.mrf.mxu1  ;;  %v1263_v20 = vpop.f32.mrf.mxu0  ;;  %v2139_v32 = vadd.f32 %v4194_v22, %v2011_v21  ;;  %v2235_v28 = vsel %vm1712_vm3, %v2211_v12, 0.0  ;;  %v2108_v35 = vsel %vm1709_vm2, %v5560_v29, 0.0  ;;  %v5567_v29 = vld [vmem:[#allocation25_spill] sm:$0xff] }
 0x1c5   : > { %v2012_v37 = vadd.f32 %v4184_v19, %v1888_v39  ;;  %v4532_v10 = vsel %vm1939_vm1, %v1936_v8, %v1937_v26  ;;  %v2061_v2 = vrot.slane %v1151_v3, 7  ;;  %v2173_v36 = vrot.slane %v1263_v20, 1 }
 0x1c6   : > { %v1857_v49 = vadd.f32 %v5561_v4, %v1733_v9  ;;  %v1155_v14 = vpop.f32.mrf.mxu1  ;;  %v1267_v17 = vpop.f32.mrf.mxu0  ;;  %v4538_v22 = vadd.f32 %v2235_v28, %v2139_v32  ;;  %v1826_v21 = vsel %vm1709_vm2, %v5565_v34, 0.0 }
 0x1c7   : > { %v4542_v0 = vsel %vm1783_vm0, %v2060_v44, %v2061_v2  ;;  %v2210_v19 = vsel %vm1939_vm1, %v2172_v25, %v2173_v36  ;;  %v1938_v8 = vrot.slane %v1155_v14, 1  ;;  %v1734_v53 = vadd.f32 %v4273_v16, %v1267_v17  ;;  %v5568_v17 = vld [vmem:[#allocation48_spill] sm:$0xff] }
 0x1c8   : > { %5562 = vst [vmem:[#allocation44_spill] sm:$0xff] %v4538_v22  ;;  %v1889_v1 = vadd.f32 %v1857_v49, %v5564_v63  ;;  %v1157_v27 = vpop.f32.mrf.mxu1  ;;  %v1269_v62 = vpop.f32.mrf.mxu0  ;;  %v2140_v44 = vadd.f32 %v2108_v35, %v2012_v37 }
 0x1c9   : > { %v4556_v39 = vsel %vm1939_vm1, %v1937_v26, %v1938_v8  ;;  %v1858_v25 = vadd.f32 %v1826_v21, %v1734_v53  ;;  %v2062_v12 = vrot.slane %v1157_v27, 7  ;;  %v2174_v9 = vrot.slane %v1269_v62, 1 }
 0x1ca   : > { %v2013_v3 = vadd.f32 %v1981_v41, %v1889_v1  ;;  %v1159_v20 = vpop.f32.mrf.mxu1  ;;  %v1271_v32 = vpop.f32.mrf.mxu0  ;;  %v4558_v28 = vadd.f32 %v2210_v19, %v2140_v44  ;;  %v5569_v19 = vld [vmem:[#allocation46_spill] sm:$0xff]  ;;  %v5570_v41 = vld [vmem:[#allocation28_spill] sm:$0xff] }
 0x1cb   : > { %v1890_v4 = vadd.f32 %v1858_v25, %v5567_v29  ;;  %v4563_v49 = vsel %vm1783_vm0, %v2061_v2, %v2062_v12  ;;  %v2209_v37 = vsel %vm1939_vm1, %v2173_v36, %v2174_v9  ;;  %v1735_v26 = vadd.f32 %v4273_v16, %v1271_v32  ;;  %v5571_v2 = vld [vmem:[#allocation52_spill] sm:$0xff]  ;;  %v5572_v36 = vld [vmem:[#allocation57_spill] sm:$0xff]  ;;  %v5575_v29 = vld [vmem:[#allocation22_spill] sm:$0xff] }
 0x1cc   : > { %5566 = vst [vmem:[#allocation24_spill] sm:$0xff] %v4558_v28  ;;  %v1160_v35 = vpop.f32.mrf.mxu1  ;;  %v1273_v14 = vpop.f32.mrf.mxu0  ;;  %v2141_v8 = vadd.f32 %v5568_v17, %v2013_v3  ;;  %v2237_v53 = vsel %vm1712_vm3, %v2209_v37, 0.0  ;;  %v2110_v21 = vsel %vm1709_vm2, %v5571_v2, 0.0  ;;  %v1720_v27 = vadd.f32 %v4273_v16, %v5572_v36  ;;  %v5574_v3 = vld [vmem:[#allocation27_spill] sm:$0xff] }
 0x1cd   : > { %v2014_v59 = vadd.f32 %v5569_v19, %v1890_v4  ;;  %v1859_v63 = vadd.f32 %v5570_v41, %v1735_v26  ;;  %v2063_v1 = vrot.slane %v1160_v35, 7  ;;  %v2175_v34 = vrot.slane %v1273_v14, 1  ;;  %v5577_v35 = vld [vmem:[#allocation50_spill] sm:$0xff] }
 0x1ce   : > { %v1277_v62 = vpop.f32.mrf.mxu0  ;;  %v1390_v44 = vpop.f32.mrf.mxu1  ;;  %v4578_v25 = vadd.f32 %v2237_v53, %v2141_v8  ;;  %v5576_v4 = vrot.slane %v5575_v29, 7  ;;  %v1983_v14 = vsel %vm1712_vm3, %v5577_v35, 0.0 }
 0x1cf   : > { %v1891_v20 = vadd.f32 %v1859_v63, %v5574_v3  ;;  %v4583_v32 = vsel %vm1783_vm0, %v2062_v12, %v2063_v1  ;;  %v2208_v26 = vsel %vm1939_vm1, %v2174_v9, %v2175_v34  ;;  %v1736_v8 = vadd.f32 %v4273_v16, %v1277_v62  ;;  %v5578_v63 = vld [vmem:[#allocation30_spill] sm:$0xff] }
 0x1d0   : > { %5573 = vst [vmem:[#allocation42_spill] sm:$0xff] %v4578_v25  ;;  %v2095_v37 = vsel %vm1783_vm0, %v2063_v1, %v5576_v4  ;;  %v1279_v53 = vpop.f32.mrf.mxu0  ;;  %v1391_v12 = vpop.f32.mrf.mxu1  ;;  %v2142_v19 = vadd.f32 %v2110_v21, %v2014_v59  ;;  %v1828_v1 = vsel %vm1709_vm2, %v5578_v63, 0.0  ;;  %v5581_v59 = vld [vmem:[#allocation29_spill] sm:$0xff] }
 0x1d1   : > { %v2096_v17 = vsel %vm1709_vm2, %v2095_v37, 0.0  ;;  %v2015_v41 = vadd.f32 %v1983_v14, %v1891_v20  ;;  %v2176_v2 = vrot.slane %v1279_v53, 1  ;;  %v1860_v9 = vadd.f32 %v1828_v1, %v1736_v8  ;;  %v5580_v37 = vld [vmem:[#allocation64_spill] sm:$0xff]  ;;  %v5582_v12 = vld [vmem:[#allocation58_spill] sm:$0xff]  ;;  %v5584_v53 = vld [vmem:[#allocation61_spill] sm:$0xff] }
 0x1d2   : > { %v2128_v36 = vadd.f32 %v2096_v17, %v1720_v27  ;;  %v1281_v44 = vpop.f32.mrf.mxu0  ;;  %v1392_v3 = vpop.f32.mrf.mxu1  ;;  %v4600_v29 = vadd.f32 %v2208_v26, %v2142_v19  ;;  %v5583_v17 = vld [vmem:[#allocation32_spill] sm:$0xff]  ;;  %v5585_v19 = vld [vmem:[#allocation54_spill] sm:$0xff] }
 0x1d3   : > { %v2207_v4 = vsel %vm1939_vm1, %v2175_v34, %v2176_v2  ;;  %v1737_v62 = vadd.f32 %v4273_v16, %v1281_v44  ;;  %v1892_v21 = vadd.f32 %v1860_v9, %v5581_v59  ;;  %v2143_v63 = vadd.f32 %v5582_v12, %v2015_v41  ;;  %v5587_v59 = vld [vmem:[#allocation31_spill] sm:$0xff] }
 0x1d4   : > { %5579 = vst [vmem:[#allocation23_spill] sm:$0xff] %v4600_v29  ;;  %v2256_v35 = vadd.f32 %v5580_v37, %v2128_v36  ;;  %v1283_v20 = vpop.f32.mrf.mxu0  ;;  %v1394_v14 = vpop.f32.mrf.mxu1  ;;  %v2239_v27 = vsel %vm1712_vm3, %v2207_v4, 0.0  ;;  %v2112_v34 = vsel %vm1709_vm2, %v5584_v53, 0.0  ;;  %v2288_v44 = vrot.slane %v1392_v3, 7 }
 0x1d5   : > { %v1861_v8 = vadd.f32 %v5583_v17, %v1737_v62  ;;  %v2177_v26 = vrot.slane %v1283_v20, 1  ;;  %v2016_v1 = vadd.f32 %v5585_v19, %v1892_v21  ;;  %v4617_v9 = vadd.f32 %v2239_v27, %v2143_v63  ;;  %v5588_v14 = vld [vmem:[#allocation60_spill] sm:$0xff]  ;;  %v5589_v21 = vld [vmem:[#allocation34_spill] sm:$0xff] }
 0x1d6   : > { %v1287_v36 = vpop.f32.mrf.mxu0  ;;  %v4615_v37 = vpop.f32.mrf.mxu1  ;;  %v1985_v12 = vsel %vm1712_vm3, %v5588_v14, 0.0  ;;  %v1830_v3 = vsel %vm1709_vm2, %v5589_v21, 0.0  ;;  %v5591_v21 = vld [vmem:[#allocation33_spill] sm:$0xff] }
 0x1d7   : > { %5586 = vst [vmem:[#allocation26_spill] sm:$0xff] %v4617_v9  ;;  %v1893_v41 = vadd.f32 %v1861_v8, %v5587_v59  ;;  %v2206_v4 = vsel %vm1939_vm1, %v2176_v2, %v2177_v26  ;;  %v1738_v62 = vadd.f32 %v4273_v16, %v1287_v36  ;;  %v5468_v20 = vrot.slane %v4615_v37, 7 }
 0x1d8   : > { %v1289_v17 = vpop.f32.mrf.mxu0  ;;  %v1399_v63 = vpop.f32.mrf.mxu1  ;;  %v2144_v27 = vadd.f32 %v2112_v34, %v2016_v1 }
 0x1d9   : > { %v2017_v53 = vadd.f32 %v1985_v12, %v1893_v41  ;;  %v1862_v8 = vadd.f32 %v1830_v3, %v1738_v62  ;;  %v2178_v19 = vrot.slane %v1289_v17, 1  ;;  %v2348_v2 = vsel %vm1783_vm0, %v2288_v44, %v5468_v20  ;;  %v5592_v44 = vld [vmem:[#allocation63_spill] sm:$0xff] }
 0x1da   : > { %v2349_v36 = vsel %vm1709_vm2, %v2348_v2, 0.0  ;;  %v1291_v59 = vpop.f32.mrf.mxu0  ;;  %v4636_v14 = vpop.f32.mrf.mxu1  ;;  %v4638_v9 = vadd.f32 %v2206_v4, %v2144_v27  ;;  %v5593_v2 = vld [vmem:[#allocation62_spill] sm:$0xff]  ;;  %v5595_v27 = vld [vmem:[#allocation36_spill] sm:$0xff] }
 0x1db   : > { %v1894_v29 = vadd.f32 %v1862_v8, %v5591_v21  ;;  %v2205_v34 = vsel %vm1939_vm1, %v2177_v26, %v2178_v19  ;;  %v2379_v1 = vadd.f32 %v2349_v36, %v2256_v35  ;;  %v1739_v41 = vadd.f32 %v4273_v16, %v1291_v59  ;;  %v5597_v36 = vld [vmem:[#allocation66_spill] sm:$0xff] }
 0x1dc   : > { %5590 = vst [vmem:[#allocation25_spill] sm:$0xff] %v4638_v9  ;;  %v1293_v62 = vpop.f32.mrf.mxu0  ;;  %v4644_v12 = vpop.f32.mrf.mxu1  ;;  %v2145_v3 = vadd.f32 %v5592_v44, %v2017_v53  ;;  %v2241_v17 = vsel %vm1712_vm3, %v2205_v34, 0.0  ;;  %v2114_v59 = vsel %vm1709_vm2, %v5597_v36, 0.0  ;;  %v5598_v53 = vld [vmem:[#allocation35_spill] sm:$0xff] }
 0x1dd   : > { %v2018_v20 = vadd.f32 %v5593_v2, %v1894_v29  ;;  %v4650_v4 = vadd.f32 %v2379_v1, %v1399_v63  ;;  %v1863_v8 = vadd.f32 %v5595_v27, %v1739_v41  ;;  %v2179_v21 = vrot.slane %v1293_v62, 1  ;;  %v5599_v63 = vld [vmem:[#allocation65_spill] sm:$0xff]  ;;  %v5600_v41 = vld [vmem:[#allocation38_spill] sm:$0xff] }
 0x1de   : > { %v1297_v9 = vpop.f32.mrf.mxu0  ;;  %v4653_v26 = vpop.f32.mrf.mxu1  ;;  %v4655_v35 = vadd.f32 %v2241_v17, %v2145_v3  ;;  %v1987_v1 = vsel %vm1712_vm3, %v5599_v63, 0.0  ;;  %v1832_v62 = vsel %vm1709_vm2, %v5600_v41, 0.0 }
 0x1df   : > { %5594 = vst [vmem:[#allocation48_spill] sm:$0xff] %v4650_v4  ;;  %v1895_v44 = vadd.f32 %v1863_v8, %v5598_v53  ;;  %v2204_v34 = vsel %vm1939_vm1, %v2178_v19, %v2179_v21  ;;  %v1740_v29 = vadd.f32 %v4273_v16, %v1297_v9  ;;  %v2146_v2 = vadd.f32 %v2114_v59, %v2018_v20  ;;  %v5602_v9 = vld [vmem:[#allocation37_spill] sm:$0xff] }
 0x1e0   : > { %5596 = vst [vmem:[#allocation46_spill] sm:$0xff] %v4655_v35  ;;  %v1299_v3 = vpop.f32.mrf.mxu0  ;;  %v4670_v17 = vpop.f32.mrf.mxu1 }
 0x1e1   : > { %v2019_v27 = vadd.f32 %v1987_v1, %v1895_v44  ;;  %v1864_v36 = vadd.f32 %v1832_v62, %v1740_v29  ;;  %v2180_v8 = vrot.slane %v1299_v3, 1  ;;  %v4674_v19 = vadd.f32 %v2204_v34, %v2146_v2  ;;  %v5603_v44 = vld [vmem:[#allocation67_spill] sm:$0xff]  ;;  %v5604_v1 = vld [vmem:[#allocation40_spill] sm:$0xff] }
 0x1e2   : > { %v1301_v53 = vpop.f32.mrf.mxu0  ;;  %v4672_v35 = vpop.f32.mrf.mxu1 }
 0x1e3   : > { %5601 = vst [vmem:[#allocation28_spill] sm:$0xff] %v4674_v19  ;;  %v1896_v25 = vadd.f32 %v1864_v36, %v5602_v9  ;;  %v2203_v63 = vsel %vm1939_vm1, %v2179_v21, %v2180_v8  ;;  %v1741_v28 = vadd.f32 %v4273_v16, %v1301_v53  ;;  %v2147_v20 = vadd.f32 %v4332_v6, %v2019_v27  ;;  %v5606_v53 = vld [vmem:[#allocation39_spill] sm:$0xff] }
 0x1e4   : > { %v1303_v41 = vpop.f32.mrf.mxu0  ;;  %v4680_v4 = vpop.f32.mrf.mxu1  ;;  %v2243_v59 = vsel %vm1712_vm3, %v2203_v63, 0.0  ;;  %v2116_v21 = vsel %vm1709_vm2, %v4353_v57, 0.0 }
 0x1e5   : > { %v2020_v29 = vadd.f32 %v5603_v44, %v1896_v25  ;;  %v1865_v34 = vadd.f32 %v5604_v1, %v1741_v28  ;;  %v2181_v62 = vrot.slane %v1303_v41, 1  ;;  %v4689_v36 = vadd.f32 %v2243_v59, %v2147_v20  ;;  %v5607_v25 = vld [vmem:[#allocation43_spill] sm:$0xff] }
 0x1e6   : > { %v1307_v3 = vpop.f32.mrf.mxu0  ;;  %v4687_v2 = vpop.f32.mrf.mxu1  ;;  %v1989_v28 = vsel %vm1712_vm3, %v4346_v15, 0.0  ;;  %v1834_v63 = vsel %vm1709_vm2, %v5607_v25, 0.0 }
 0x1e7   : > { %5605 = vst [vmem:[#allocation52_spill] sm:$0xff] %v4689_v36  ;;  %v1897_v9 = vadd.f32 %v1865_v34, %v5606_v53  ;;  %v2202_v6 = vsel %vm1939_vm1, %v2180_v8, %v2181_v62  ;;  %v1742_v27 = vadd.f32 %v4273_v16, %v1307_v3  ;;  %v2148_v59 = vadd.f32 %v2116_v21, %v2020_v29  ;;  %v5610_v3 = vld [vmem:[#allocation41_spill] sm:$0xff] }
 0x1e8   : > { %v1309_v41 = vpop.f32.mrf.mxu0  ;;  %v4704_v20 = vpop.f32.mrf.mxu1 }
 0x1e9   : > { %5608 = vst [vmem:[#allocation57_spill] sm:$0xff] %v4704_v20  ;;  %v2021_v57 = vadd.f32 %v1989_v28, %v1897_v9  ;;  %v1866_v44 = vadd.f32 %v1834_v63, %v1742_v27  ;;  %v2182_v1 = vrot.slane %v1309_v41, 1  ;;  %v4708_v8 = vadd.f32 %v2202_v6, %v2148_v59  ;;  %v5612_v27 = vld [vmem:[#allocation47_spill] sm:$0xff]  ;;  %v4766_v20 = vld [vmem:[%s3733_s29 + $0x10] sm:$0xff]  }
 0x1ea   : > { %v1311_v34 = vpop.f32.mrf.mxu0  ;;  %v4706_v53 = vpop.f32.mrf.mxu1  ;;  %v5613_v41 = vld [vmem:[#allocation51_spill] sm:$0xff]  ;;  %5621 = vst [vmem:[#allocation29_spill] sm:$0xff] %v4766_v20 }
 0x1eb   : > { %5609 = vst [vmem:[#allocation27_spill] sm:$0xff] %v4708_v8  ;;  %v1898_v36 = vadd.f32 %v1866_v44, %v5610_v3  ;;  %v2201_v15 = vsel %vm1939_vm1, %v2181_v62, %v2182_v1  ;;  %v1743_v19 = vadd.f32 %v4273_v16, %v1311_v34  ;;  %v2149_v29 = vadd.f32 %v4374_v18, %v2021_v57  ;;  %v5614_v44 = vld [vmem:[#allocation15_spill] sm:$0xff]  ;;  %v5617_v34 = vld [vmem:[#allocation45_spill] sm:$0xff] }
 0x1ec   : > { %v1313_v25 = vpop.f32.mrf.mxu0  ;;  %v4714_v22 = vpop.f32.mrf.mxu1  ;;  %v2245_v21 = vsel %vm1712_vm3, %v2201_v15, 0.0  ;;  %v1836_v62 = vsel %vm1709_vm2, %v5613_v41, 0.0  ;;  %v4729_v18 = vsel %vm1709_vm2, %v5614_v44, 0.0  ;;  %v5615_v57 = vld [vmem:[#allocation19_spill] sm:$0xff]  ;;  %v4754_v44 = vld [vmem:[%s3733_s29 + $0x78] sm:$0xff]  }
 0x1ed   : > { %5611 = vst [vmem:[#allocation22_spill] sm:$0xff] %v4714_v22  ;;  %v2022_v9 = vadd.f32 %v4364_v55, %v1898_v36  ;;  %v1867_v6 = vadd.f32 %v5612_v27, %v1743_v19  ;;  %v2183_v28 = vrot.slane %v1313_v25, 1  ;;  %v4734_v55 = vsel %vm1709_vm2, %v5615_v57, 0.0  ;;  %v4761_v22 = vld [vmem:[%s3733_s29] sm:$0xff]  }
 0x1ee   : > { %v1317_v63 = vpop.f32.mrf.mxu0  ;;  %v4724_v59 = vpop.f32.mrf.mxu1  ;;  %v4736_v19 = vadd.f32 %v2245_v21, %v2149_v29  ;;  %v2118_v36 = vsel %vm1709_vm2, %v4395_v13, 0.0  ;;  %v1991_v27 = vsel %vm1712_vm3, %v4388_v30, 0.0  ;;  %v5619_v21 = vld [vmem:[#allocation56_spill] sm:$0xff]  ;;  %5620 = vst [vmem:[#allocation64_spill] sm:$0xff] %v4761_v22 }
 0x1ef   : > { %v1899_v3 = vadd.f32 %v1867_v6, %v5617_v34  ;;  %v2200_v15 = vsel %vm1939_vm1, %v2182_v1, %v2183_v28  ;;  %v1744_v25 = vadd.f32 %v4273_v16, %v1317_v63  ;;  %v1838_v13 = vsel %vm1709_vm2, %v5619_v21, 0.0 }
 0x1f0   : > { %5616 = vst [vmem:[#allocation50_spill] sm:$0xff] %v4736_v19  ;;  %v1319_v41 = vpop.f32.mrf.mxu0  ;;  %v4748_v29 = vpop.f32.mrf.mxu1  ;;  %v2150_v57 = vadd.f32 %v2118_v36, %v2022_v9 }
 0x1f1   : > { %5618 = vst [vmem:[#allocation30_spill] sm:$0xff] %v4748_v29  ;;  %v2023_v1 = vadd.f32 %v1991_v27, %v1899_v3  ;;  %v1868_v63 = vadd.f32 %v1836_v62, %v1744_v25  ;;  %v2184_v34 = vrot.slane %v1319_v41, 1  ;;  %v5623_v62 = vld [vmem:[#allocation49_spill] sm:$0xff]  ;;  %v4776_v27 = vld [vmem:[%s3733_s29 + $0x8] sm:$0xff]  }
 0x1f2   : > { %v1321_v30 = vpop.f32.mrf.mxu0  ;;  %v4758_v8 = vpop.f32.mrf.mxu1  ;;  %v4769_v9 = vadd.f32 %v2200_v15, %v2150_v57  ;;  %5624 = vst [vmem:[#allocation32_spill] sm:$0xff] %v4776_v27  ;;  %v4795_v15 = vld [vmem:[%s3733_s29 + $0x18] sm:$0xff]   ;;  %v4830_v27 = vld [vmem:[%s3733_s29 + $0x40] sm:$0xff]  }
 0x1f3   : > { %v1900_v36 = vadd.f32 %v1868_v63, %v5623_v62  ;;  %v2199_v3 = vsel %vm1939_vm1, %v2183_v28, %v2184_v34  ;;  %v1745_v25 = vadd.f32 %v4273_v16, %v1321_v30  ;;  %v2151_v57 = vadd.f32 %v4416_v46, %v2023_v1  ;;  %v5625_v30 = vld [vmem:[#allocation55_spill] sm:$0xff]  ;;  %5627 = vst [vmem:[#allocation54_spill] sm:$0xff] %v4795_v15 }
 0x1f4   : > { %5622 = vst [vmem:[#allocation58_spill] sm:$0xff] %v4769_v9  ;;  %v1323_v21 = vpop.f32.mrf.mxu0  ;;  %v4779_v29 = vpop.f32.mrf.mxu1  ;;  %v2247_v63 = vsel %vm1712_vm3, %v2199_v3, 0.0  ;;  %v4789_v9 = vld [vmem:[%s3733_s29 + $0x20] sm:$0xff]   ;;  %v5629_v3 = vld [vmem:[#allocation53_spill] sm:$0xff]  ;;  %v1993_v46 = vsel %vm1712_vm3, %v4430_v50, 0.0  ;;  %v1995_v50 = vsel %vm1712_vm3, %v4472_v61, 0.0 }
 0x1f5   : > { %v2024_v28 = vadd.f32 %v4406_v11, %v1900_v36  ;;  %v1869_v62 = vadd.f32 %v5625_v30, %v1745_v25  ;;  %v2185_v19 = vrot.slane %v1323_v21, 1  ;;  %5626 = vst [vmem:[#allocation61_spill] sm:$0xff] %v4789_v9  ;;  %v4800_v36 = vadd.f32 %v2247_v63, %v2151_v57  ;;  %v4815_v57 = vld [vmem:[%s3733_s29 + $0x30] sm:$0xff]   ;;  %5632 = vst [vmem:[#allocation33_spill] sm:$0xff] %v4830_v27  ;;  %v4840_v61 = vld [vmem:[%s3733_s29 + $0x38] sm:$0xff]  }
 0x1f6   : > { %v1327_v22 = vpop.f32.mrf.mxu0  ;;  %v4792_v6 = vpop.f32.mrf.mxu1  ;;  %v2120_v21 = vsel %vm1709_vm2, %v4437_v51, 0.0  ;;  %5631 = vst [vmem:[#allocation34_spill] sm:$0xff] %v4815_v57  ;;  %v4819_v51 = vld [vmem:[%s3733_s29 + $0x28] sm:$0xff]   ;;  %5635 = vst [vmem:[#allocation62_spill] sm:$0xff] %v4840_v61  ;;  %v4896_v61 = vld [vmem:[%s3733_s29 + $0x60] sm:$0xff]  }
 0x1f7   : > { %5628 = vst [vmem:[#allocation31_spill] sm:$0xff] %v4800_v36  ;;  %v1901_v25 = vadd.f32 %v1869_v62, %v5629_v3  ;;  %v2198_v30 = vsel %vm1939_vm1, %v2184_v34, %v2185_v19  ;;  %v1746_v41 = vadd.f32 %v4273_v16, %v1327_v22  ;;  %v2152_v34 = vadd.f32 %v2120_v21, %v2024_v28  ;;  %v5634_v28 = vld [vmem:[#allocation11_spill] sm:$0xff] }
 0x1f8   : > { %v1329_v1 = vpop.f32.mrf.mxu0  ;;  %v4812_v11 = vpop.f32.mrf.mxu1  ;;  %v2122_v21 = vsel %vm1709_vm2, %v4479_v40, 0.0  ;;  %v4858_v40 = vsel %vm1712_vm3, %v4514_v48, 0.0 }
 0x1f9   : > { %5630 = vst [vmem:[#allocation60_spill] sm:$0xff] %v4812_v11  ;;  %v2025_v3 = vadd.f32 %v1993_v46, %v1901_v25  ;;  %v1870_v22 = vadd.f32 %v1838_v13, %v1746_v41  ;;  %v2186_v36 = vrot.slane %v1329_v1, 1  ;;  %v4833_v11 = vadd.f32 %v2198_v30, %v2152_v34  ;;  %v4863_v34 = vld [vmem:[%s3733_s29 + $0x50] sm:$0xff]  }
 0x1fa   : > { %v1331_v15 = vpop.f32.mrf.mxu0  ;;  %v4826_v20 = vpop.f32.mrf.mxu1  ;;  %5637 = vst [vmem:[#allocation36_spill] sm:$0xff] %v4863_v34 }
 0x1fb   : > { %5633 = vst [vmem:[#allocation63_spill] sm:$0xff] %v4833_v11  ;;  %v1902_v13 = vadd.f32 %v1870_v22, %v5634_v28  ;;  %v2197_v41 = vsel %vm1939_vm1, %v2185_v19, %v2186_v36  ;;  %v1747_v46 = vadd.f32 %v4273_v16, %v1331_v15  ;;  %v2153_v22 = vadd.f32 %v4458_v60, %v2025_v3  ;;  %v5636_v28 = vld [vmem:[#allocation13_spill] sm:$0xff] }
 0x1fc   : > { %v1333_v25 = vpop.f32.mrf.mxu0  ;;  %v4846_v30 = vpop.f32.mrf.mxu1  ;;  %v2249_v19 = vsel %vm1712_vm3, %v2197_v41, 0.0  ;;  %v2290_v41 = vrot.slane %v4636_v14, 7  ;;  %v2124_v60 = vsel %vm1709_vm2, %v4521_v24, 0.0 }
 0x1fd   : > { %v2026_v15 = vadd.f32 %v4448_v45, %v1902_v13  ;;  %v1871_v62 = vadd.f32 %v5636_v28, %v1747_v46  ;;  %v2187_v1 = vrot.slane %v1333_v25, 1  ;;  %v4866_v3 = vadd.f32 %v2249_v19, %v2153_v22  ;;  %v4869_v45 = vld [vmem:[%s3733_s29 + $0x48] sm:$0xff]  }
 0x1fe   : > { %v1337_v9 = vpop.f32.mrf.mxu0  ;;  %v4860_v11 = vpop.f32.mrf.mxu1  ;;  %5639 = vst [vmem:[#allocation35_spill] sm:$0xff] %v4869_v45  ;;  %v5640_v46 = vld [vmem:[#allocation12_spill] sm:$0xff]  ;;  %v2291_v22 = vrot.slane %v4653_v26, 7 }
 0x1ff   : > { %5638 = vst [vmem:[#allocation66_spill] sm:$0xff] %v4866_v3  ;;  %v1903_v25 = vadd.f32 %v1871_v62, %v5640_v46  ;;  %v2196_v48 = vsel %vm1939_vm1, %v2186_v36, %v2187_v1  ;;  %v1748_v28 = vadd.f32 %v4273_v16, %v1337_v9  ;;  %v2154_v13 = vadd.f32 %v2122_v21, %v2026_v15 }
 0x200   : > { %v1339_v19 = vpop.f32.mrf.mxu0  ;;  %v4881_v63 = vpop.f32.mrf.mxu1  ;;  %v4889_v9 = vsel %vm1712_vm3, %v4556_v39, 0.0  ;;  %v5642_v15 = vrot.slane %v4615_v37, 7  ;;  %v5643_v39 = vld [vmem:[#allocation14_spill] sm:$0xff]  ;;  %v2346_v21 = vsel %vm1783_vm0, %v2290_v41, %v2291_v22 }
 0x201   : > { %v2027_v62 = vadd.f32 %v1995_v50, %v1903_v25  ;;  %v1872_v46 = vadd.f32 %v4729_v18, %v1748_v28  ;;  %v2188_v36 = vrot.slane %v1339_v19, 1  ;;  %v4893_v26 = vadd.f32 %v2196_v48, %v2154_v13  ;;  %v4900_v50 = vld [vmem:[%s3733_s29 + $0x58] sm:$0xff]  }
 0x202   : > { %v1341_v24 = vpop.f32.mrf.mxu0  ;;  %v4891_v27 = vpop.f32.mrf.mxu1  ;;  %v2347_v25 = vsel %vm1783_vm0, %v5642_v15, %v2290_v41  ;;  %v2126_v48 = vsel %vm1709_vm2, %v4563_v49, 0.0  ;;  %v5644_v15 = vld [vmem:[#allocation17_spill] sm:$0xff]  ;;  %v5645_v49 = vld [vmem:[#allocation68_spill] sm:$0xff] }
 0x203   : > { %5641 = vst [vmem:[#allocation65_spill] sm:$0xff] %v4893_v26  ;;  %v1904_v28 = vadd.f32 %v1872_v46, %v5643_v39  ;;  %v2195_v19 = vsel %vm1939_vm1, %v2187_v1, %v2188_v36  ;;  %v1749_v13 = vadd.f32 %v4273_v16, %v1341_v24  ;;  %v2155_v37 = vadd.f32 %v4500_v56, %v2027_v62 }
 0x204   : > { %v1343_v18 = vpop.f32.mrf.mxu0  ;;  %v4916_v3 = vpop.f32.mrf.mxu1  ;;  %v2251_v46 = vsel %vm1712_vm3, %v2195_v19, 0.0  ;;  %v2292_v1 = vrot.slane %v4672_v35, 7  ;;  %v2380_v34 = vadd.f32 %v2347_v25, %v5645_v49  ;;  %v5646_v19 = vld [vmem:[#allocation16_spill] sm:$0xff]  ;;  %v2293_v25 = vrot.slane %v4687_v2, 7 }
 0x205   : > { %v2028_v24 = vadd.f32 %v4490_v31, %v1904_v28  ;;  %v1873_v39 = vadd.f32 %v5644_v15, %v1749_v13  ;;  %v2189_v14 = vrot.slane %v1343_v18, 1  ;;  %v4927_v45 = vadd.f32 %v2251_v46, %v2155_v37  ;;  %v4936_v18 = vld [vmem:[%s3733_s29 + $0x70] sm:$0xff]   ;;  %v4945_v49 = vld [vmem:[%s3733_s29 + $0x68] sm:$0xff]  }
 0x206   : > { %v1347_v41 = vpop.f32.mrf.mxu0  ;;  %v4925_v26 = vpop.f32.mrf.mxu1  ;;  %v2351_v28 = vsel %vm1709_vm2, %v2346_v21, 0.0  ;;  %v4953_v21 = vadd.f32 %v2380_v34, %v4644_v12  ;;  %v2295_v62 = vrot.slane %v4724_v59, 7  ;;  %v3457_v12 = vld [vmem:[%s5455_s2] ss:$0 sm:$0xff]  ;;  %v5711_v33 = vunpack.c.l.bf16 %v4945_v49 }
 0x207   : > { %v1905_v57 = vadd.f32 %v1873_v39, %v5646_v19  ;;  %v2194_v31 = vsel %vm1939_vm1, %v2188_v36, %v2189_v14  ;;  %v1750_v35 = vadd.f32 %v4273_v16, %v1347_v41  ;;  %v2156_v46 = vadd.f32 %v2124_v60, %v2028_v24 }
 0x208   : > { %v1349_v13 = vpop.f32.mrf.mxu0  ;;  %v4941_v37 = vpop.f32.mrf.mxu1  ;;  %v2345_v16 = vsel %vm1783_vm0, %v2291_v22, %v2292_v1  ;;  %v2593_v39 = vunpack.c.h.bf16 %v4945_v49  ;;  %v5647_v22 = vld [vmem:[#allocation18_spill] sm:$0xff]  ;;  %v2381_v2 = vadd.f32 %v2351_v28, %v4348_v23  ;;  %v2344_v23 = vsel %vm1783_vm0, %v2292_v1, %v2293_v25 }
 0x209   : > { %v2029_v36 = vadd.f32 %v4858_v40, %v1905_v57  ;;  %v1874_v41 = vadd.f32 %v4734_v55, %v1750_v35  ;;  %v2190_v19 = vrot.slane %v1349_v13, 1  ;;  %v4958_v15 = vadd.f32 %v2194_v31, %v2156_v46  ;;  %v5648_v46 = vld [vmem:[#allocation21_spill] sm:$0xff] }
 0x20a   : > { %v1351_v60 = vpop.f32.mrf.mxu0  ;;  %v4956_v24 = vpop.f32.mrf.mxu1  ;;  %v2382_v34 = vadd.f32 %v2345_v16, %v4370_v52  ;;  %v2294_v13 = vrot.slane %v4706_v53, 7  ;;  %v2297_v52 = vrot.slane %v4792_v6, 7  ;;  %v2299_v28 = vrot.slane %v4860_v11, 7 }
 0x20b   : > { %v1906_v56 = vadd.f32 %v1874_v41, %v5647_v22  ;;  %v2193_v55 = vsel %vm1939_vm1, %v2189_v14, %v2190_v19  ;;  %v1751_v57 = vadd.f32 %v3457_v12, %v1351_v60  ;;  %v2157_v35 = vadd.f32 %v4542_v0, %v2029_v36 }
 0x20c   : > { %v1353_v40 = vpop.f32.mrf.mxu0  ;;  %v4970_v31 = vpop.f32.mrf.mxu1  ;;  %v2253_v59 = vsel %vm1712_vm3, %v2193_v55, 0.0  ;;  %v2342_v53 = vsel %vm1783_vm0, %v2294_v13, %v2295_v62  ;;  %v4991_v12 = vadd.f32 %v2381_v2, %v4670_v17  ;;  %v4994_v6 = vadd.f32 %v2382_v34, %v4680_v4  ;;  %v5650_v2 = vld [vmem:[#allocation59_spill] sm:$0xff] }
 0x20d   : > { %v2030_v14 = vadd.f32 %v4532_v10, %v1906_v56  ;;  %v1875_v41 = vadd.f32 %v5648_v46, %v1751_v57  ;;  %v2191_v22 = vrot.slane %v1353_v40, 1  ;;  %v4984_v36 = vadd.f32 %v2253_v59, %v2157_v35  ;;  %v5649_v56 = vld [vmem:[#allocation20_spill] sm:$0xff] }
 0x20e   : > { %v4982_v16 = vpop.f32.mrf.mxu1  ;;  %v3195_v0 = vpop.f32.mrf.mxu0  ;;  %v2296_v10 = vrot.slane %v4758_v8, 7  ;;  %v2298_v11 = vrot.slane %v4826_v20, 7  ;;  %v2353_v8 = vsel %vm1709_vm2, %v2344_v23, 0.0  ;;  %v5651_v4 = vrot.slane %v5650_v2, 1 }
 0x20f   : > { %v1907_v60 = vadd.f32 %v1875_v41, %v5649_v56  ;;  %v2158_v55 = vadd.f32 %v2126_v48, %v2030_v14  ;;  %v2192_v1 = vsel %vm1939_vm1, %v2190_v19, %v2191_v22  ;;  %v2343_v48 = vsel %vm1783_vm0, %v2293_v25, %v2294_v13 }
 0x210   : > { %v4999_v57 = vpop.f32.mrf.mxu1  ;;  %v5001_v40 = vpop.f32.mrf.mxu0  ;;  %v2223_v20 = vsel %vm1939_vm1, %v2191_v22, %v5651_v4  ;;  %v2355_v19 = vsel %vm1709_vm2, %v2342_v53, 0.0  ;;  %v2340_v34 = vsel %vm1783_vm0, %v2296_v10, %v2297_v52  ;;  %v2338_v35 = vsel %vm1783_vm0, %v2298_v11, %v2299_v28 }
 0x211   : > { %v2031_v17 = vadd.f32 %v4889_v9, %v1907_v60  ;;  %v2301_v59 = vrot.slane %v4925_v26, 7  ;;  %v2341_v9 = vsel %vm1783_vm0, %v2295_v62, %v2296_v10  ;;  %v2300_v13 = vrot.slane %v4891_v27, 7 }
 0x212   : > { %v5019_v14 = vpop.f32.mrf.mxu1  ;;  %v3196_v25 = vpop.f32.mrf.mxu0  ;;  %v2286_v41 = vadd.f32 %v2192_v1, %v2158_v55  ;;  %v2383_v22 = vadd.f32 %v2353_v8, %v4390_v7  ;;  %v2384_v23 = vadd.f32 %v2343_v48, %v4412_v5  ;;  %v2255_v53 = vsel %vm1712_vm3, %v2223_v20, 0.0 }
 0x213   : > { %v2159_v46 = vadd.f32 %v4583_v32, %v2031_v17  ;;  %v2445_v56 = vrot.slane %v3196_v25, 1  ;;  %v2357_v2 = vsel %vm1709_vm2, %v2340_v34, 0.0  ;;  %v2339_v27 = vsel %vm1783_vm0, %v2297_v52, %v2298_v11 }
 0x214   : > { %v5029_v26 = vpop.f32.mrf.mxu1  ;;  %v1583_v60 = vpop.f32.mrf.mxu0  ;;  %v2359_v32 = vsel %vm1709_vm2, %v2338_v35, 0.0  ;;  %v2385_v7 = vadd.f32 %v2355_v19, %v4432_v54  ;;  %v2386_v5 = vadd.f32 %v2341_v9, %v4454_v58  ;;  %v2336_v10 = vsel %vm1783_vm0, %v2300_v13, %v2301_v59  ;;  %v5654_v9 = vld [vmem:[#allocation57_spill] sm:$0xff] }
 0x215   : > { %v2287_v62 = vadd.f32 %v2255_v53, %v2159_v46  ;;  %v2444_v55 = vrot.slane %v3195_v0, 1  ;;  %v2337_v48 = vsel %vm1783_vm0, %v2299_v28, %v2300_v13  ;;  %v5652_v52 = vunpack.c.l.bf16 %v4754_v44  ;;  %v5655_v13 = vld [vmem:[#allocation22_spill] sm:$0xff] }
 0x216   : > { %v5041_v1 = vpop.f32.mrf.mxu1  ;;  %v3199_v8 = vpop.f32.mrf.mxu0  ;;  %v5653_v17 = vunpack.c.h.bf16 %v4754_v44  ;;  %v2303_v54 = vrot.slane %v4982_v16, 7  ;;  %v2387_v58 = vadd.f32 %v2357_v2, %v4474_v47  ;;  %v2388_v20 = vadd.f32 %v2339_v27, %v4496_v42  ;;  %v5656_v46 = vld [vmem:[#allocation30_spill] sm:$0xff] }
 0x217   : > { %v2628_v11 = vadd.f32 %v5652_v52, %v2286_v41  ;;  %v2389_v0 = vadd.f32 %v2359_v32, %v4516_v43  ;;  %v2502_v19 = vsel %vm1939_vm1, %v2444_v55, %v2445_v56  ;;  %v2361_v35 = vsel %vm1709_vm2, %v2336_v10, 0.0  ;;  %v5657_v41 = vld [vmem:[#allocation44_spill] sm:$0xff] }
 0x218   : > { %v2629_v4 = vadd.f32 %v5653_v17, %v2287_v62  ;;  %v5055_v34 = vpop.f32.mrf.mxu1  ;;  %v1595_v28 = vpop.f32.mrf.mxu0  ;;  %v2302_v44 = vrot.slane %v4956_v24, 7  ;;  %v2415_v47 = vadd.f32 %v2383_v22, %v5654_v9  ;;  %v5062_v42 = vadd.f32 %v2384_v23, %v5655_v13  ;;  %v5658_v22 = vld [vmem:[#allocation48_spill] sm:$0xff]  ;;  %v5664_v13 = vld [vmem:[#allocation42_spill] sm:$0xff] }
 0x219   : > { %v2446_v16 = vrot.slane %v1595_v28, 1  ;;  %v5065_v43 = vadd.f32 %v2385_v7, %v5656_v46  ;;  %v2390_v53 = vadd.f32 %v2337_v48, %v5657_v41  ;;  %v5071_v27 = vadd.f32 %v2386_v5, %v4779_v29  ;;  %v5659_v62 = vld [vmem:[#allocation60_spill] sm:$0xff] }
 0x21a   : > { %v3136_v25 = vpack.c.bf16 %v2629_v4, %v2628_v11  ;;  %v5068_v60 = vpop.f32.mrf.mxu1  ;;  %v3200_v2 = vpop.f32.mrf.mxu0  ;;  %v2334_v24 = vsel %vm1783_vm0, %v2302_v44, %v2303_v54  ;;  %v2534_v23 = vadd.f32 %v2502_v19, %v5658_v22  ;;  %v5084_v7 = vadd.f32 %v2387_v58, %v5659_v62  ;;  %v5660_v29 = vld [vmem:[#allocation24_spill] sm:$0xff]  ;;  %v5665_v22 = vld [vmem:[#allocation23_spill] sm:$0xff] }
 0x21b   : > { %v2501_v32 = vsel %vm1939_vm1, %v2445_v56, %v2446_v16  ;;  %v5087_v10 = vadd.f32 %v2388_v20, %v4846_v30  ;;  %v2391_v5 = vadd.f32 %v2361_v35, %v5660_v29  ;;  %v5095_v11 = vadd.f32 %v2389_v0, %v4881_v63  ;;  %v5661_v63 = vld [vmem:[#allocation64_spill] sm:$0xff] }
 0x21c   : > { %3152 = vst [vmem:[%s5075_s23 + $0x78] sm:$0xff] %v3136_v25   ;;  %v2505_v55 = vsel %vm1712_vm3, %v2501_v32, 0.0  ;;  %v5092_v48 = vpop.f32.mrf.mxu1  ;;  %v1598_v52 = vpop.f32.mrf.mxu0  ;;  %v2335_v56 = vsel %vm1783_vm0, %v2301_v59, %v2302_v44  ;;  %v2449_v4 = vrot.slane %v3200_v2, 1  ;;  %v5101_v30 = vadd.f32 %v2390_v53, %v4916_v3 }
 0x21d   : > { %v2535_v17 = vadd.f32 %v2505_v55, %v4953_v21  ;;  %v2363_v58 = vsel %vm1709_vm2, %v2334_v24, 0.0  ;;  %v2448_v20 = vrot.slane %v3199_v8, 1  ;;  %v2447_v19 = vrot.slane %v1598_v52, 1 }
 0x21e   : > { %v1487_v28 = vpop.f32.mrf.mxu1  ;;  %v3203_v35 = vpop.f32.mrf.mxu0  ;;  %v2304_v25 = vrot.slane %v5019_v14, 7  ;;  %v5662_v0 = vunpack.c.l.bf16 %v5661_v63  ;;  %v2305_v59 = vrot.slane %v5041_v1, 7  ;;  %v5663_v21 = vunpack.c.h.bf16 %v5661_v63 }
 0x21f   : > { %v5112_v3 = vadd.f32 %v2391_v5, %v4941_v37  ;;  %v2392_v46 = vadd.f32 %v2335_v56, %v5664_v13  ;;  %v2499_v8 = vsel %vm1939_vm1, %v2447_v19, %v2448_v20  ;;  %v2500_v14 = vsel %vm1939_vm1, %v2446_v16, %v2447_v19 }
 0x220   : > { %v2598_v9 = vadd.f32 %v5662_v0, %v2534_v23  ;;  %v2599_v44 = vadd.f32 %v5663_v21, %v2535_v17  ;;  %v5119_v41 = vpop.f32.mrf.mxu1  ;;  %v1611_v53 = vpop.f32.mrf.mxu0  ;;  %v2498_v1 = vsel %vm1939_vm1, %v2448_v20, %v2449_v4  ;;  %v2507_v37 = vsel %vm1712_vm3, %v2499_v8, 0.0  ;;  %v5666_v17 = vld [vmem:[#allocation32_spill] sm:$0xff] }
 0x221   : > { %v2536_v24 = vadd.f32 %v2500_v14, %v4991_v12  ;;  %v2393_v23 = vadd.f32 %v2363_v58, %v5665_v22  ;;  %v2537_v32 = vadd.f32 %v2507_v37, %v4994_v6  ;;  %v2307_v62 = vrot.slane %v1487_v28, 7 }
 0x222   : > { %v3061_v2 = vpack.c.bf16 %v2599_v44, %v2598_v9  ;;  %v2450_v29 = vrot.slane %v1611_v53, 1  ;;  %v5128_v5 = vpop.f32.mrf.mxu1  ;;  %v3204_v16 = vpop.f32.mrf.mxu0  ;;  %v2333_v55 = vsel %vm1783_vm0, %v2303_v54, %v2304_v25  ;;  %v2332_v52 = vsel %vm1783_vm0, %v2304_v25, %v2305_v59 }
 0x223   : > { %v2306_v56 = vrot.slane %v5068_v60, 7  ;;  %v5667_v12 = vunpack.c.l.bf16 %v5666_v17  ;;  %v2538_v58 = vadd.f32 %v2498_v1, %v2415_v47  ;;  %v5668_v6 = vunpack.c.h.bf16 %v5666_v17  ;;  %v5670_v1 = vld [vmem:[#allocation29_spill] sm:$0xff] }
 0x224   : > { %3062 = vst [vmem:[%s5075_s23] sm:$0xff] %v3061_v2   ;;  %v2497_v28 = vsel %vm1939_vm1, %v2449_v4, %v2450_v29  ;;  %v2453_v63 = vrot.slane %v3204_v16, 1  ;;  %v5142_v0 = vpop.f32.mrf.mxu1  ;;  %v1614_v54 = vpop.f32.mrf.mxu0  ;;  %v5145_v9 = vadd.f32 %v2392_v46, %v4970_v31  ;;  %v2443_v60 = vrot.slane %v5001_v40, 1  ;;  %v5669_v46 = vld [vmem:[#allocation26_spill] sm:$0xff] }
 0x225   : > { %v2600_v20 = vadd.f32 %v5667_v12, %v2536_v24  ;;  %v2601_v19 = vadd.f32 %v5668_v6, %v2537_v32  ;;  %v2452_v25 = vrot.slane %v3203_v35, 1  ;;  %v2509_v47 = vsel %vm1712_vm3, %v2497_v28, 0.0 }
 0x226   : > { %v2330_v44 = vsel %vm1783_vm0, %v2306_v56, %v2307_v62  ;;  %v2539_v4 = vadd.f32 %v2509_v47, %v5062_v42  ;;  %v2308_v13 = vrot.slane %v5128_v5, 7  ;;  %v5154_v8 = vpop.f32.mrf.mxu1  ;;  %v3207_v14 = vpop.f32.mrf.mxu0  ;;  %v5157_v31 = vadd.f32 %v2393_v23, %v4999_v57 }
 0x227   : > { %v3066_v21 = vpack.c.bf16 %v2601_v19, %v2600_v20  ;;  %v2394_v53 = vadd.f32 %v2333_v55, %v5669_v46  ;;  %v2365_v35 = vsel %vm1709_vm2, %v2332_v52, 0.0  ;;  %v2451_v2 = vrot.slane %v1614_v54, 1 }
 0x228   : > { %v5671_v37 = vunpack.c.l.bf16 %v5670_v1  ;;  %v2331_v42 = vsel %vm1783_vm0, %v2305_v59, %v2306_v56  ;;  %v5672_v22 = vunpack.c.h.bf16 %v5670_v1  ;;  %v2494_v57 = vsel %vm1939_vm1, %v2452_v25, %v2453_v63  ;;  %v5171_v23 = vpop.f32.mrf.mxu1  ;;  %v1627_v5 = vpop.f32.mrf.mxu0 }
 0x229   : > { %3138 = vst [vmem:[%s5075_s23 + $0x8] sm:$0xff] %v3066_v21   ;;  %v2367_v16 = vsel %vm1709_vm2, %v2330_v44, 0.0  ;;  %v2495_v55 = vsel %vm1939_vm1, %v2451_v2, %v2452_v25  ;;  %v2496_v59 = vsel %vm1939_vm1, %v2450_v29, %v2451_v2  ;;  %v2454_v52 = vrot.slane %v1627_v5, 1  ;;  %v5673_v25 = vld [vmem:[#allocation25_spill] sm:$0xff]  ;;  %v5675_v44 = vld [vmem:[#allocation54_spill] sm:$0xff] }
 0x22a   : > { %v2602_v24 = vadd.f32 %v5671_v37, %v2538_v58  ;;  %v2603_v32 = vadd.f32 %v5672_v22, %v2539_v4  ;;  %v2329_v17 = vsel %vm1783_vm0, %v2307_v62, %v2308_v13  ;;  %v2511_v12 = vsel %vm1712_vm3, %v2495_v55, 0.0  ;;  %v5184_v58 = vpop.f32.mrf.mxu1  ;;  %v3208_v6 = vpop.f32.mrf.mxu0  ;;  %v5674_v62 = vld [vmem:[#allocation46_spill] sm:$0xff]  ;;  %v5679_v22 = vld [vmem:[#allocation52_spill] sm:$0xff] }
 0x22b   : > { %v2540_v20 = vadd.f32 %v2496_v59, %v5065_v43  ;;  %v2542_v19 = vadd.f32 %v2494_v57, %v5084_v7  ;;  %v2541_v28 = vadd.f32 %v2511_v12, %v5071_v27  ;;  %v2309_v54 = vrot.slane %v5154_v8, 7 }
 0x22c   : > { %v3071_v56 = vpack.c.bf16 %v2603_v32, %v2602_v24  ;;  %v2493_v29 = vsel %vm1939_vm1, %v2453_v63, %v2454_v52  ;;  %v2395_v47 = vadd.f32 %v2365_v35, %v5673_v25  ;;  %v2396_v21 = vadd.f32 %v2331_v42, %v5674_v62  ;;  %v5198_v2 = vpop.f32.mrf.mxu1  ;;  %v1630_v7 = vpop.f32.mrf.mxu0  ;;  %v5678_v24 = vld [vmem:[#allocation28_spill] sm:$0xff] }
 0x22d   : > { %v5676_v4 = vunpack.c.l.bf16 %v5675_v44  ;;  %v2513_v46 = vsel %vm1712_vm3, %v2493_v29, 0.0  ;;  %v5201_v27 = vadd.f32 %v2394_v53, %v5029_v26  ;;  %v5677_v1 = vunpack.c.h.bf16 %v5675_v44 }
 0x22e   : > { %3139 = vst [vmem:[%s5075_s23 + $0x10] sm:$0xff] %v3071_v56   ;;  %v2543_v35 = vadd.f32 %v2513_v46, %v5087_v10  ;;  %v2457_v37 = vrot.slane %v3208_v6, 1  ;;  %v2397_v42 = vadd.f32 %v2367_v16, %v5678_v24  ;;  %v2398_v32 = vadd.f32 %v2329_v17, %v5679_v22  ;;  %v5208_v55 = vpop.f32.mrf.mxu1  ;;  %v3211_v59 = vpop.f32.mrf.mxu0  ;;  %v5680_v56 = vld [vmem:[#allocation61_spill] sm:$0xff] }
 0x22f   : > { %v2604_v43 = vadd.f32 %v5676_v4, %v2540_v20  ;;  %v2605_v63 = vadd.f32 %v5677_v1, %v2541_v28  ;;  %v2456_v57 = vrot.slane %v3207_v14, 1  ;;  %v2455_v5 = vrot.slane %v1630_v7, 1 }
 0x230   : > { %v5681_v12 = vunpack.c.l.bf16 %v5680_v56  ;;  %v2328_v10 = vsel %vm1783_vm0, %v2308_v13, %v2309_v54  ;;  %v5682_v20 = vunpack.c.h.bf16 %v5680_v56  ;;  %v2427_v6 = vadd.f32 %v2395_v47, %v5055_v34  ;;  %v5226_v28 = vpop.f32.mrf.mxu1  ;;  %v1643_v29 = vpop.f32.mrf.mxu0 }
 0x231   : > { %v3076_v53 = vpack.c.bf16 %v2605_v63, %v2604_v43  ;;  %v5220_v14 = vadd.f32 %v2396_v21, %v5092_v48  ;;  %v2491_v17 = vsel %vm1939_vm1, %v2455_v5, %v2456_v57  ;;  %v2490_v25 = vsel %vm1939_vm1, %v2456_v57, %v2457_v37 }
 0x232   : > { %v2606_v26 = vadd.f32 %v5681_v12, %v2542_v19  ;;  %v2607_v16 = vadd.f32 %v5682_v20, %v2543_v35  ;;  %v2492_v19 = vsel %vm1939_vm1, %v2454_v52, %v2455_v5  ;;  %v2515_v34 = vsel %vm1712_vm3, %v2491_v17, 0.0  ;;  %v1511_v44 = vpop.f32.mrf.mxu1  ;;  %v3212_v4 = vpop.f32.mrf.mxu0  ;;  %v5686_v20 = vld [vmem:[#allocation34_spill] sm:$0xff] }
 0x233   : > { %3140 = vst [vmem:[%s5075_s23 + $0x18] sm:$0xff] %v3076_v53   ;;  %v2544_v48 = vadd.f32 %v2492_v19, %v5095_v11  ;;  %v2369_v47 = vsel %vm1709_vm2, %v2328_v10, 0.0  ;;  %v2545_v62 = vadd.f32 %v2515_v34, %v5101_v30  ;;  %v2311_v52 = vrot.slane %v5208_v55, 7 }
 0x234   : > { %v3081_v13 = vpack.c.bf16 %v2607_v16, %v2606_v26  ;;  %v2458_v21 = vrot.slane %v1643_v29, 1  ;;  %v5239_v43 = vadd.f32 %v2397_v42, %v5119_v41  ;;  %v5242_v46 = vadd.f32 %v2398_v32, %v5142_v0  ;;  %v5253_v41 = vpop.f32.mrf.mxu1  ;;  %v1646_v42 = vpop.f32.mrf.mxu0  ;;  %v5685_v0 = vld [vmem:[#allocation27_spill] sm:$0xff] }
 0x235   : > { %v5683_v7 = vunpack.c.l.bf16 %v4819_v51  ;;  %v2461_v1 = vrot.slane %v3212_v4, 1  ;;  %v2310_v63 = vrot.slane %v5184_v58, 7  ;;  %v2546_v30 = vadd.f32 %v2490_v25, %v5112_v3 }
 0x236   : > { %3141 = vst [vmem:[%s5075_s23 + $0x20] sm:$0xff] %v3081_v13   ;;  %v5684_v35 = vunpack.c.h.bf16 %v4819_v51  ;;  %v2489_v22 = vsel %vm1939_vm1, %v2457_v37, %v2458_v21  ;;  %v2399_v32 = vadd.f32 %v2369_v47, %v5685_v0  ;;  %v2460_v57 = vrot.slane %v3211_v59, 1  ;;  %v1517_v12 = vpop.f32.mrf.mxu1  ;;  %v3215_v37 = vpop.f32.mrf.mxu0 }
 0x237   : > { %v2608_v11 = vadd.f32 %v5683_v7, %v2544_v48  ;;  %v2517_v5 = vsel %vm1712_vm3, %v2489_v22, 0.0  ;;  %v2459_v55 = vrot.slane %v1646_v42, 1  ;;  %v2326_v3 = vsel %vm1783_vm0, %v2310_v63, %v2311_v52 }
 0x238   : > { %v2609_v24 = vadd.f32 %v5684_v35, %v2545_v62  ;;  %v2547_v51 = vadd.f32 %v2517_v5, %v5145_v9  ;;  %v2312_v56 = vrot.slane %v1511_v44, 7  ;;  %v2486_v26 = vsel %vm1939_vm1, %v2460_v57, %v2461_v1  ;;  %v5275_v25 = vpop.f32.mrf.mxu1  ;;  %v1659_v34 = vpop.f32.mrf.mxu0 }
 0x239   : > { %v2487_v53 = vsel %vm1939_vm1, %v2459_v55, %v2460_v57  ;;  %v2488_v59 = vsel %vm1939_vm1, %v2458_v21, %v2459_v55  ;;  %v2313_v10 = vrot.slane %v1517_v12, 7  ;;  %v5687_v16 = vunpack.c.l.bf16 %v5686_v20 }
 0x23a   : > { %v3086_v58 = vpack.c.bf16 %v2609_v24, %v2608_v11  ;;  %v5688_v19 = vunpack.c.h.bf16 %v5686_v20  ;;  %v2519_v29 = vsel %vm1712_vm3, %v2487_v53, 0.0  ;;  %v2548_v13 = vadd.f32 %v2488_v59, %v5157_v31  ;;  %v5689_v31 = vld [vmem:[#allocation62_spill] sm:$0xff]  ;;  %v1521_v35 = vpop.f32.mrf.mxu1  ;;  %v3216_v8 = vpop.f32.mrf.mxu0  ;;  %v5694_v59 = vld [vmem:[#allocation33_spill] sm:$0xff] }
 0x23b   : > { %v2610_v17 = vadd.f32 %v5687_v16, %v2546_v30  ;;  %v2327_v48 = vsel %vm1783_vm0, %v2309_v54, %v2310_v63  ;;  %v2371_v47 = vsel %vm1709_vm2, %v2326_v3, 0.0  ;;  %v2549_v62 = vadd.f32 %v2519_v29, %v5201_v27 }
 0x23c   : > { %3142 = vst [vmem:[%s5075_s23 + $0x28] sm:$0xff] %v3086_v58   ;;  %v2611_v9 = vadd.f32 %v5688_v19, %v2547_v51  ;;  %v2324_v21 = vsel %vm1783_vm0, %v2312_v56, %v2313_v10  ;;  %v2550_v4 = vadd.f32 %v2486_v26, %v2427_v6  ;;  %v5690_v7 = vunpack.c.l.bf16 %v5689_v31  ;;  %v1523_v5 = vpop.f32.mrf.mxu1  ;;  %v1662_v55 = vpop.f32.mrf.mxu0  ;;  %v5692_v58 = vld [vmem:[#allocation50_spill] sm:$0xff] }
 0x23d   : > { %v2462_v30 = vrot.slane %v1659_v34, 1  ;;  %v5691_v24 = vunpack.c.h.bf16 %v5689_v31  ;;  %v2464_v54 = vrot.slane %v3215_v37, 1  ;;  %v2314_v63 = vrot.slane %v1521_v35, 7 }
 0x23e   : > { %v3091_v44 = vpack.c.bf16 %v2611_v9, %v2610_v17  ;;  %v2612_v11 = vadd.f32 %v5690_v7, %v2548_v13  ;;  %v2465_v42 = vrot.slane %v3216_v8, 1  ;;  %v2431_v0 = vadd.f32 %v2399_v32, %v5171_v23  ;;  %v5693_v32 = vld [vmem:[#allocation58_spill] sm:$0xff]  ;;  %v3219_v53 = vpop.f32.mrf.mxu0  ;;  %v5696_v17 = vld [vmem:[#allocation31_spill] sm:$0xff] }
 0x23f   : > { %v2613_v22 = vadd.f32 %v5691_v24, %v2549_v62  ;;  %v2325_v27 = vsel %vm1783_vm0, %v2311_v52, %v2312_v56  ;;  %v2373_v6 = vsel %vm1709_vm2, %v2324_v21, 0.0  ;;  %v2485_v57 = vsel %vm1939_vm1, %v2461_v1, %v2462_v30  ;;  %v1527_v1 = vpop.f32.mrf.mxu1  ;;  %v5697_v9 = vld [vmem:[#allocation63_spill] sm:$0xff] }
 0x240   : > { %3143 = vst [vmem:[%s5075_s23 + $0x30] sm:$0xff] %v3091_v44   ;;  %v2400_v3 = vadd.f32 %v2327_v48, %v5692_v58  ;;  %v2521_v12 = vsel %vm1712_vm3, %v2485_v57, 0.0  ;;  %v2482_v23 = vsel %vm1939_vm1, %v2464_v54, %v2465_v42  ;;  %v2401_v52 = vadd.f32 %v2371_v47, %v5693_v32  ;;  %v1675_v21 = vpop.f32.mrf.mxu0  ;;  %v5699_v44 = vld [vmem:[#allocation66_spill] sm:$0xff] }
 0x241   : > { %v3096_v51 = vpack.c.bf16 %v2613_v22, %v2612_v11  ;;  %v2551_v56 = vadd.f32 %v2521_v12, %v5220_v14  ;;  %v2323_v37 = vsel %vm1783_vm0, %v2313_v10, %v2314_v63  ;;  %v2463_v26 = vrot.slane %v1662_v55, 1  ;;  %v1529_v62 = vpop.f32.mrf.mxu1  ;;  %v5703_v12 = vld [vmem:[#allocation65_spill] sm:$0xff] }
 0x242   : > { %v5695_v20 = vunpack.c.l.bf16 %v5694_v59  ;;  %v2402_v19 = vadd.f32 %v2325_v27, %v5696_v17  ;;  %v2403_v29 = vadd.f32 %v2373_v6, %v5697_v9  ;;  %v2315_v13 = vrot.slane %v1527_v1, 7  ;;  %v5704_v17 = vld [vmem:[#allocation36_spill] sm:$0xff] }
 0x243   : > { %3144 = vst [vmem:[%s5075_s23 + $0x38] sm:$0xff] %v3096_v51   ;;  %v5698_v34 = vunpack.c.h.bf16 %v5694_v59  ;;  %v2554_v47 = vadd.f32 %v2482_v23, %v2431_v0  ;;  %v2483_v14 = vsel %vm1939_vm1, %v2463_v26, %v2464_v54  ;;  %v2484_v10 = vsel %vm1939_vm1, %v2462_v30, %v2463_v26  ;;  %v1531_v22 = vpop.f32.mrf.mxu1  ;;  %v3220_v54 = vpop.f32.mrf.mxu0  ;;  %v5700_v0 = vld [vmem:[#allocation35_spill] sm:$0xff] }
 0x244   : > { %v2614_v16 = vadd.f32 %v5695_v20, %v2550_v4  ;;  %v2404_v4 = vadd.f32 %v2323_v37, %v5699_v44  ;;  %v2523_v31 = vsel %vm1712_vm3, %v2483_v14, 0.0  ;;  %v2552_v7 = vadd.f32 %v2484_v10, %v5239_v43 }
 0x245   : > { %v2615_v48 = vadd.f32 %v5698_v34, %v2551_v56  ;;  %v2322_v11 = vsel %vm1783_vm0, %v2314_v63, %v2315_v13  ;;  %v2553_v8 = vadd.f32 %v2523_v31, %v5242_v46  ;;  %v2466_v30 = vrot.slane %v1675_v21, 1  ;;  %v1533_v32 = vpop.f32.mrf.mxu1  ;;  %v1678_v56 = vpop.f32.mrf.mxu0 }
 0x246   : > { %v2375_v24 = vsel %vm1709_vm2, %v2322_v11, 0.0  ;;  %v5701_v27 = vunpack.c.l.bf16 %v5700_v0  ;;  %v2468_v57 = vrot.slane %v3219_v53, 1  ;;  %v2316_v55 = vrot.slane %v1531_v22, 7 }
 0x247   : > { %v3101_v35 = vpack.c.bf16 %v2615_v48, %v2614_v16  ;;  %v2469_v58 = vrot.slane %v3220_v54, 1  ;;  %v2432_v43 = vadd.f32 %v2400_v3, %v5198_v2  ;;  %v5702_v63 = vunpack.c.h.bf16 %v5700_v0  ;;  %v1537_v20 = vpop.f32.mrf.mxu1  ;;  %v3223_v16 = vpop.f32.mrf.mxu0 }
 0x248   : > { %v2616_v6 = vadd.f32 %v5701_v27, %v2552_v7  ;;  %v2405_v46 = vadd.f32 %v2375_v24, %v5703_v12  ;;  %v2481_v23 = vsel %vm1939_vm1, %v2465_v42, %v2466_v30  ;;  %v2433_v37 = vadd.f32 %v2401_v52, %v5226_v28 }
 0x249   : > { %3145 = vst [vmem:[%s5075_s23 + $0x40] sm:$0xff] %v3101_v35   ;;  %v2617_v51 = vadd.f32 %v5702_v63, %v2553_v8  ;;  %v2525_v26 = vsel %vm1712_vm3, %v2481_v23, 0.0  ;;  %v2478_v2 = vsel %vm1939_vm1, %v2468_v57, %v2469_v58  ;;  %v2321_v3 = vsel %vm1783_vm0, %v2315_v13, %v2316_v55 }
 0x24a   : > { %v2434_v1 = vadd.f32 %v2402_v19, %v5253_v41  ;;  %v2435_v53 = vadd.f32 %v2403_v29, %v5275_v25  ;;  %v2555_v42 = vadd.f32 %v2525_v26, %v2432_v43  ;;  %v5705_v9 = vunpack.c.l.bf16 %v5704_v17  ;;  %v1539_v19 = vpop.f32.mrf.mxu1  ;;  %v1691_v25 = vpop.f32.mrf.mxu0 }
 0x24b   : > { %v3106_v59 = vpack.c.bf16 %v2617_v51, %v2616_v6  ;;  %v2436_v52 = vadd.f32 %v2404_v4, %v1523_v5  ;;  %v2467_v34 = vrot.slane %v1678_v56, 1  ;;  %v2317_v48 = vrot.slane %v1537_v20, 7 }
 0x24c   : > { %v2618_v28 = vadd.f32 %v5705_v9, %v2554_v47  ;;  %v2437_v14 = vadd.f32 %v2405_v46, %v1529_v62  ;;  %v5706_v10 = vunpack.c.h.bf16 %v5704_v17  ;;  %v2558_v13 = vadd.f32 %v2478_v2, %v2435_v53  ;;  %v1541_v7 = vpop.f32.mrf.mxu1  ;;  %v3224_v11 = vpop.f32.mrf.mxu0 }
 0x24d   : > { %3146 = vst [vmem:[%s5075_s23 + $0x48] sm:$0xff] %v3106_v59   ;;  %v2406_v41 = vadd.f32 %v2321_v3, %v4927_v45  ;;  %v2479_v29 = vsel %vm1939_vm1, %v2467_v34, %v2468_v57  ;;  %v2480_v47 = vsel %vm1939_vm1, %v2466_v30, %v2467_v34  ;;  %v2320_v5 = vsel %vm1783_vm0, %v2316_v55, %v2317_v48 }
 0x24e   : > { %v2619_v21 = vadd.f32 %v5706_v10, %v2555_v42  ;;  %v2470_v44 = vrot.slane %v1691_v25, 1  ;;  %v2527_v4 = vsel %vm1712_vm3, %v2479_v29, 0.0  ;;  %v2556_v31 = vadd.f32 %v2480_v47, %v2433_v37  ;;  %v1694_v57 = vpop.f32.mrf.mxu0 }
 0x24f   : > { %v2377_v45 = vsel %vm1709_vm2, %v2320_v5, 0.0  ;;  %v2557_v35 = vadd.f32 %v2527_v4, %v2434_v1  ;;  %v2318_v30 = vrot.slane %v1541_v7, 7  ;;  %v5707_v22 = vunpack.c.l.bf16 %v4900_v50  ;;  %v1543_v1 = vpop.f32.mrf.mxu1 }
 0x250   : > { %v3111_v62 = vpack.c.bf16 %v2619_v21, %v2618_v28  ;;  %v2407_v8 = vadd.f32 %v2377_v45, %v4958_v15  ;;  %v2477_v24 = vsel %vm1939_vm1, %v2469_v58, %v2470_v44  ;;  %v2472_v0 = vrot.slane %v3223_v16, 1 }
 0x251   : > { %v2620_v54 = vadd.f32 %v5707_v22, %v2556_v31  ;;  %v2529_v27 = vsel %vm1712_vm3, %v2477_v24, 0.0  ;;  %v2473_v6 = vrot.slane %v3224_v11, 1  ;;  %v5708_v55 = vunpack.c.h.bf16 %v4900_v50 }
 0x252   : > { %3147 = vst [vmem:[%s5075_s23 + $0x50] sm:$0xff] %v3111_v62   ;;  %v2439_v63 = vadd.f32 %v2407_v8, %v1539_v19  ;;  %v2559_v15 = vadd.f32 %v2529_v27, %v2436_v52  ;;  %v2319_v58 = vsel %vm1783_vm0, %v2317_v48, %v2318_v30  ;;  %v2471_v23 = vrot.slane %v1694_v57, 1 }
 0x253   : > { %v2621_v43 = vadd.f32 %v5708_v55, %v2557_v35  ;;  %v2474_v51 = vsel %vm1939_vm1, %v2472_v0, %v2473_v6  ;;  %v2408_v12 = vadd.f32 %v2319_v58, %v4984_v36  ;;  %v2503_v46 = vsel %vm1939_vm1, %v2473_v6, %v2443_v60 }
 0x254   : > { %v5709_v50 = vunpack.c.l.bf16 %v4896_v61  ;;  %v2438_v37 = vadd.f32 %v2406_v41, %v1533_v32  ;;  %v5710_v2 = vunpack.c.h.bf16 %v4896_v61  ;;  %v2562_v53 = vadd.f32 %v2474_v51, %v2439_v63 }
 0x255   : > { %v3116_v26 = vpack.c.bf16 %v2621_v43, %v2620_v54  ;;  %v2440_v36 = vadd.f32 %v2408_v12, %v1543_v1  ;;  %v2475_v40 = vsel %vm1939_vm1, %v2471_v23, %v2472_v0  ;;  %v2476_v60 = vsel %vm1939_vm1, %v2470_v44, %v2471_v23 }
 0x256   : > { %v2622_v56 = vadd.f32 %v5709_v50, %v2558_v13  ;;  %v2623_v3 = vadd.f32 %v5710_v2, %v2559_v15  ;;  %v2533_v32 = vsel %vm1712_vm3, %v2503_v46, 0.0  ;;  %v2531_v61 = vsel %vm1712_vm3, %v2475_v40, 0.0 }
 0x257   : > { %3148 = vst [vmem:[%s5075_s23 + $0x58] sm:$0xff] %v3116_v26   ;;  %v2560_v42 = vadd.f32 %v2476_v60, %v2437_v14  ;;  %v2563_v20 = vadd.f32 %v2533_v32, %v2440_v36  ;;  %v2561_v16 = vadd.f32 %v2531_v61, %v2438_v37  ;;  %v5712_v9 = vunpack.c.l.bf16 %v4936_v18 }
 0x258   : > { %v3121_v59 = vpack.c.bf16 %v2623_v3, %v2622_v56  ;;  %v5713_v52 = vunpack.c.h.bf16 %v4936_v18 }
 0x259   : > { %v2624_v17 = vadd.f32 %v5711_v33, %v2560_v42  ;;  %v2626_v28 = vadd.f32 %v5712_v9, %v2562_v53  ;;  %v2625_v34 = vadd.f32 %v2593_v39, %v2561_v16 }
 0x25a   : > { %3149 = vst [vmem:[%s5075_s23 + $0x60] sm:$0xff] %v3121_v59   ;;  %v2627_v38 = vadd.f32 %v5713_v52, %v2563_v20 }
 0x25b   : > { %v3126_v14 = vpack.c.bf16 %v2625_v34, %v2624_v17 }
 0x25c   : > { %v3131_v48 = vpack.c.bf16 %v2627_v38, %v2626_v28 }
 0x25d   : > { %3150 = vst [vmem:[%s5075_s23 + $0x68] sm:$0xff] %v3126_v14  }
 0x25e   : > { %3151 = vst [vmem:[%s5075_s23 + $0x70] sm:$0xff] %v3131_v48  }
 0x25f   : > { %3525 = shalt.err (!%p3522_p0)
}
 0x260   : > { %s3526_s27 = scalar_lea.hbm %s5407_s8, 2048  ;;  %s3530_s18 = scalar_lea.hbm %s5456_s3, 8192 }
 0x261   : > { %p3527_p5 = scmp.ne.s32.totalorder %s5407_s8, %s3526_s27  ;;  %p3531_p4 = scmp.lt.s32.totalorder %s5407_s8, %s5456_s3 }
 0x262   : > { %p3532_p6 = scmp.lt.s32.totalorder %s3530_s18, %s3526_s27 }
 0x263   : > { %p3528_p9 = pnand %p3527_p5, %p5714_p10 }
 0x264   : > { %p3533_p8 = por %p3532_p6, %p3531_p4 }
 0x265   : > { %p3529_p1 = pneg %p3528_p9 }
 0x267   : > { %p3534_p3 = pnand %p3533_p8, %p3529_p1 }
 0x269   : > { %3537 = shalt.err (!%p3534_p3)
}
 0x26a   : > { %s3590_s22 = smov 64   ;;  %s3591_s23 = smov 4  }
 0x26b   : > { %3247 = dma.vmem_to_hbm [thread:$0]  (%p5714_p10), %s5409_s30, 2048, %s5407_s8, %s2791_s16, %s3590_s22, %s3590_s22, %s3591_s23  }
 0x26c PF: > { %p3264_p7 = scmp.ge.s32.totalorder %s3580_s15, 2  ;;  %s2819_s25 = sand.u32 1, %s3568_s12  }
 0x26d   : > { %p5715_p11 = scmp.ne.s32.totalorder %s5490_s19, 0  ;;  %s2820_s4 = scalar_lea.sflag [#allocation4], %s2819_s25 }
 0x26f   : > { %p3258_p12 = pnand %p3264_p7, %p5715_p11 }
 0x271   : > { %p3259_p2 = pneg %p3258_p12 }
 0x273   : > { %3563 = dma.done.wait (%p3259_p2), %s2820_s4, 2048  }
 0x274   : > { %3565 = vsyncadd (%p3259_p2), %s2820_s4, 4294965248  ;;  %p17_p13 = scmp.ge.s32.totalorder %s3665_s24, 6   ;;  %s5716_s12 = smov %s3572_s13 }
 0x275   : > { %s5717_s13 = smov %s3576_s14  ;;  %s5718_s14 = smov %s3682_s5 }
 0x276   : > { %s5719_s15 = smov %s3665_s24  ;;  %19 = sbr.rel (!%p17_p13) target bundleno = 6 (0x6), region = 81 }
 0x27b   :  { %2825 = vsyncpa [#allocation3], 1 }
 0x27c   :  { %2827 = vsyncpa [#allocation3 + $0x1], 1 }
 0x27d   :  { %2828 = vsyncpa [#allocation6], 1 }
 0x27e   :  { %2829 = vsyncpa [#allocation4], 1 }
 0x27f   :  { %2831 = vsyncpa [#allocation4 + $0x1], 1 }

</bundles_post_ra>
